<compile_context>
chip_gen: v7x
topology: tpu7x:2x2x1
jax: 0.10.0
libtpu: 0.0.40
codegen_flags: <defaults>
</compile_context>

<pallas_src>
import functools

import jax
import jax.numpy as jnp
from jax import lax
from jax.experimental import pallas as pl
from jax.experimental.pallas import tpu as pltpu

# Feed the MXU bf16 operands with f32 accumulation (perf-review recommendation
# for v5e/v6e/v7x).  Set to False for strict f32 parity with PyTorch.
MXU_BF16 = True


# ------------------------------ geometry ------------------------------------ #

def compute_geometry(input_shape):
    """Static shapes implied by the PyTorch module (VALID padding)."""
    c_in, h, w = input_shape
    oh1 = (h - 8) // 4 + 1
    ow1 = (w - 8) // 4 + 1
    oh2 = (oh1 - 4) // 2 + 1
    ow2 = (ow1 - 4) // 2 + 1
    assert oh2 >= 1 and ow2 >= 1, "input spatial size too small for the convs"
    # (OH1, OW1, OH2, OW2, KH2, KW2, S2, OC1, OC2, FC_OUT)
    return (oh1, ow1, oh2, ow2, 4, 4, 2, 16, 16, 64)


# --------------------------- fused Pallas kernel ----------------------------- #

def _make_fused_kernel(geom, tile_b):
    (oh1, ow1, oh2, ow2, kh2, kw2, s2, oc1, oc2, n_out) = geom
    p2 = oh2 * ow2
    taps = kh2 * kw2
    cdt = jnp.bfloat16 if MXU_BF16 else jnp.float32

    # conv2 im2col row table: (output position p, tap c) -> conv1 output row r.
    row_of = {}
    for p in range(p2):
        o_h, o_w = divmod(p, ow2)
        for c in range(taps):
            i, j = divmod(c, kw2)
            row_of[(p, c)] = (o_h * s2 + i) * ow1 + (o_w * s2 + j)

    def kernel(p1_ref, w1_ref, b1_ref, w2_ref, b2_ref, wf_ref, bf_ref,
               o_ref, p2_scr, fc_scr):
        # ---- conv1: one MXU matmul over the whole batch tile ----------------
        x1 = p1_ref[...].astype(cdt)                           # (P1*TB, C*64)
        h1 = jnp.dot(x1, w1_ref[...].astype(cdt),
                     preferred_element_type=jnp.float32)
        h1 = jnp.maximum(h1 + b1_ref[...], 0.0)                # (P1*TB, OC1) f32

        # ---- conv2 im2col: assemble patches in VMEM scratch (no HBM) --------
        rows = {r: h1[r * tile_b:(r + 1) * tile_b, :]
                for r in sorted(set(row_of.values()))}
        for p in range(p2):
            for c in range(taps):
                r = row_of[(p, c)]
                p2_scr[p * tile_b:(p + 1) * tile_b,
                       c * oc1:(c + 1) * oc1] = rows[r]

        # ---- conv2: one MXU matmul over the assembled patches ---------------
        h2 = jnp.dot(p2_scr[...].astype(cdt), w2_ref[...].astype(cdt),
                     preferred_element_type=jnp.float32)
        h2 = jnp.maximum(h2 + b2_ref[...], 0.0)                # (P2*TB, OC2) f32

        # ---- NCHW-flatten equivalent: regroup rows per image ----------------
        # (the channel/position permutation was folded into Wfc_r at init)
        for p in range(p2):
            fc_scr[:, p * oc2:(p + 1) * oc2] = \
                h2[p * tile_b:(p + 1) * tile_b, :]

        # ---- FC --------------------------------------------------------------
        y = jnp.dot(fc_scr[...].astype(cdt), wf_ref[...].astype(cdt),
                    preferred_element_type=jnp.float32)
        o_ref[...] = jnp.maximum(y + bf_ref[...], 0.0).astype(o_ref.dtype)

    return kernel


def fused_forward(patches1, prep, geom, tile_b):
    """patches1: (T, P1*TB, K1) conv1 im2col tiles -> (T*TB, 64)."""
    t, m1, k1 = patches1.shape
    (oh1, ow1, oh2, ow2, kh2, kw2, s2, oc1, oc2, n_out) = geom
    p2 = oh2 * ow2
    k2 = kh2 * kw2 * oc1
    f_in = p2 * oc2
    assert m1 == oh1 * ow1 * tile_b

    kernel = _make_fused_kernel(geom, tile_b)

    out = pl.pallas_call(
        kernel,
        out_shape=jax.ShapeDtypeStruct((t, tile_b, n_out), jnp.float32),
        grid=(t,),
        in_specs=[
            # per-tile conv1 patches (pipelined / double-buffered over the grid)
            pl.BlockSpec((None, m1, k1), lambda b: (b, 0, 0)),
            # weights & biases: resident across all grid steps
            pl.BlockSpec((k1, oc1), lambda b: (0, 0)),      # W1  (K1, 16)
            pl.BlockSpec((1, oc1), lambda b: (0, 0)),       # b1
            pl.BlockSpec((k2, oc2), lambda b: (0, 0)),      # W2r (256, 16)
            pl.BlockSpec((1, oc2), lambda b: (0, 0)),       # b2
            pl.BlockSpec((f_in, n_out), lambda b: (0, 0)),  # Wfc_r (64, 64)
            pl.BlockSpec((1, n_out), lambda b: (0, 0)),     # bfc
        ],
        out_specs=pl.BlockSpec((None, tile_b, n_out), lambda b: (b, 0, 0)),
        scratch_shapes=[
            pltpu.VMEM((p2 * tile_b, k2), jnp.float32),     # conv2 im2col patches
            pltpu.VMEM((tile_b, f_in), jnp.float32),        # FC input (flattened)
        ],
        compiler_params=pltpu.CompilerParams(
            dimension_semantics=("parallel",),              # batch tiles (2 TCs on v7x)
            vmem_limit_bytes=32 * 1024 * 1024),
    )(patches1, prep["w1"], prep["b1"], prep["w2"], prep["b2"],
      prep["wf"], prep["bf"])
    return out.reshape(t * tile_b, n_out)


# ------------------------------- JAX glue ------------------------------------ #

def _im2col_nhwc_patches(x, kh, kw, stride):
    """x: (N, C, H, W) -> (N, OH, OW, C*KH*KW); features in (C, KH, KW) order."""
    n, c, h, w = x.shape
    oh = (h - kh) // stride + 1
    ow = (w - kw) // stride + 1
    cols = []
    for i in range(kh):
        for j in range(kw):
            cols.append(x[:, :, i:i + stride * oh:stride, j:j + stride * ow:stride])
    cols = jnp.stack(cols, axis=0).reshape(kh, kw, n, c, oh, ow)
    cols = jnp.transpose(cols, (2, 4, 5, 3, 0, 1))          # (N, OH, OW, C, KH, KW)
    return cols.reshape(n, oh, ow, c * kh * kw)


def _tile_patches(patches, tile_b):
    """(N, OH, OW, F) -> (N//TB, OH*OW*TB, F), rows ordered (oh, ow, image)."""
    n, oh, ow, f = patches.shape
    t = n // tile_b
    p = patches.reshape(t, tile_b, oh, ow, f)
    p = jnp.transpose(p, (0, 2, 3, 1, 4))
    return p.reshape(t, oh * ow * tile_b, f)


# ---------------------------- parameters ------------------------------------- #

def init_params(key, input_shape):
    """PyTorch-layout parameters (Conv2d: (OC, C, KH, KW); Linear: (out, in))."""
    c_in, h, w = input_shape
    (oh1, ow1, oh2, ow2, kh2, kw2, s2, oc1, oc2, n_out) = compute_geometry(input_shape)
    conv_out_size = oc2 * oh2 * ow2
    k = jax.random.split(key, 6)

    def init(kk, shape, fan_in):
        bound = 1.0 / jnp.sqrt(fan_in)
        return jax.random.uniform(kk, shape, jnp.float32, -bound, bound)

    return {
        "conv1_w": init(k[0], (oc1, c_in, 8, 8), c_in * 8 * 8),
        "conv1_b": init(k[1], (oc1,), c_in * 8 * 8),
        "conv2_w": init(k[2], (oc2, oc1, 4, 4), oc1 * 4 * 4),
        "conv2_b": init(k[3], (oc2,), oc1 * 4 * 4),
        "fc_w": init(k[4], (n_out, conv_out_size), conv_out_size),
        "fc_b": init(k[5], (n_out,), conv_out_size),
    }


def prepare_params(params, input_shape):
    """One-time conversion of PyTorch-layout weights into kernel matmul layouts."""
    (oh1, ow1, oh2, ow2, kh2, kw2, s2, oc1, oc2, n_out) = compute_geometry(input_shape)
    p2 = oh2 * ow2
    wdt = jnp.bfloat16 if MXU_BF16 else jnp.float32

    # conv1: columns of patches are ordered (C, KH, KW) -> standard reshape.T
    w1m = params["conv1_w"].reshape(oc1, -1).T                       # (C*64, 16)

    # conv2: kernel-assembled patch columns are ordered (tap, in_channel)
    #        W2r[(i*KW2+j)*OC1 + ic, oc2] = conv2_w[oc2, ic, i, j]
    w2r = jnp.transpose(params["conv2_w"], (2, 3, 1, 0)).reshape(kh2 * kw2 * oc1, oc2)

    # FC: kernel FC-input columns are ordered (p, oc2); PyTorch .view flatten is
    #     (oc2, p)  ->  Wfc_r[p*OC2 + oc2, o] = fc_w[o, oc2*P2 + p]
    wfr = jnp.transpose(params["fc_w"].reshape(n_out, oc2, p2),
                        (2, 1, 0)).reshape(p2 * oc2, n_out)

    return {
        "w1": w1m.astype(wdt), "b1": params["conv1_b"].reshape(1, oc1),
        "w2": w2r.astype(wdt), "b2": params["conv2_b"].reshape(1, oc2),
        "wf": wfr.astype(wdt), "bf": params["fc_b"].reshape(1, n_out),
    }


# ------------------------------ forward -------------------------------------- #

def obs_network_forward(prep, x, input_shape, tile_b=2):
    """x: (N, C, H, W) float32  ->  (N, 64) float32, one fused Pallas kernel."""
    geom = compute_geometry(input_shape)
    n = x.shape[0]
    pad = (-n) % tile_b
    if pad:
        x = jnp.concatenate([x, jnp.zeros((pad,) + x.shape[1:], x.dtype)], axis=0)
    patches = _im2col_nhwc_patches(x, 8, 8, 4)           # conv1 im2col (XLA glue)
    patches = _tile_patches(patches, tile_b)             # (T, P1*TB, C*64)
    out = fused_forward(patches, prep, geom, tile_b)
    return out[:n]


def reference_forward(params, x):
    """Pure-JAX reference matching the PyTorch module (f32)."""
    dn = ("NCHW", "OIHW", "NCHW")
    y = lax.conv_general_dilated(x, params["conv1_w"], (4, 4), "VALID",
                                 dimension_numbers=dn)
    y = jnp.maximum(y + params["conv1_b"][None, :, None, None], 0.0)
    y = lax.conv_general_dilated(y, params["conv2_w"], (2, 2), "VALID",
                                 dimension_numbers=dn)
    y = jnp.maximum(y + params["conv2_b"][None, :, None, None], 0.0)
    flat = y.reshape(x.shape[0], -1)
    return jnp.maximum(flat @ params["fc_w"].T + params["fc_b"][None, :], 0.0)


# --------------------------------- main --------------------------------------- #

if __name__ == "__main__":
    key = jax.random.PRNGKey(0)
    kx, kp = jax.random.split(key)

    # Small demo shapes: batch=4, channels=4, 28x28 spatial
    #   conv1: (28-8)/4+1 = 6  ->  conv2: (6-4)/2+1 = 2  ->  flat = 16*2*2 = 64
    input_shape = (4, 28, 28)
    batch = 4
    tile_b = 2                       # -> grid=(2,) "parallel" batch tiles
    x = jax.random.normal(kx, (batch,) + input_shape, dtype=jnp.float32)

    params = init_params(kp, input_shape)
    prepared = prepare_params(params, input_shape)

    fwd = jax.jit(functools.partial(obs_network_forward,
                                    input_shape=input_shape, tile_b=tile_b))
    out = jax.block_until_ready(fwd(prepared, x))

    assert out.shape == (batch, 64), out.shape
    assert out.dtype == jnp.float32
    assert bool(jnp.all(out >= 0.0))                     # final ReLU

    # Pure-JAX reference check (loose tolerance when feeding the MXU bf16).
    ref = reference_forward(params, x)
    err = float(jnp.max(jnp.abs(out - ref)))
    scale = float(1.0 + jnp.max(jnp.abs(ref)))
    tol = (5e-2 if MXU_BF16 else 2e-3) * scale
    assert err <= tol, (err, tol)

    print("KERNEL_OK")
</pallas_src>

<mosaic_0001>
module attributes {stable_mosaic.version = 11 : i64} {
  func.func @kernel(%arg0: i32, %arg1: memref<1x72x256xf32, #tpu.memory_space<vmem>>, %arg2: memref<256x16xbf16, #tpu.memory_space<vmem>>, %arg3: memref<1x16xf32, #tpu.memory_space<vmem>>, %arg4: memref<256x16xbf16, #tpu.memory_space<vmem>>, %arg5: memref<1x16xf32, #tpu.memory_space<vmem>>, %arg6: memref<64x64xbf16, #tpu.memory_space<vmem>>, %arg7: memref<1x64xf32, #tpu.memory_space<vmem>>, %arg8: memref<1x2x64xf32, #tpu.memory_space<vmem>>, %arg9: memref<8x256xf32, #tpu.memory_space<vmem>>, %arg10: memref<2x64xf32, #tpu.memory_space<vmem>>) attributes {dimension_semantics = [#tpu.dimension_semantics<parallel>], iteration_bounds = array<i64: 2>, scalar_prefetch = 0 : i64, scratch_operands = 2 : i64, tpu.core_type = #tpu.core_type<tc>, window_params = [{transform_indices = @transform_0, window_bounds = array<i64: 1, 72, 256>}, {pipeline_mode = #tpu.pipeline_mode<synchronous>, transform_indices = @transform_1, window_bounds = array<i64: 256, 16>}, {pipeline_mode = #tpu.pipeline_mode<synchronous>, transform_indices = @transform_2, window_bounds = array<i64: 1, 16>}, {pipeline_mode = #tpu.pipeline_mode<synchronous>, transform_indices = @transform_3, window_bounds = array<i64: 256, 16>}, {pipeline_mode = #tpu.pipeline_mode<synchronous>, transform_indices = @transform_4, window_bounds = array<i64: 1, 16>}, {pipeline_mode = #tpu.pipeline_mode<synchronous>, transform_indices = @transform_5, window_bounds = array<i64: 64, 64>}, {pipeline_mode = #tpu.pipeline_mode<synchronous>, transform_indices = @transform_6, window_bounds = array<i64: 1, 64>}, {transform_indices = @transform_7, window_bounds = array<i64: 1, 2, 64>}]} {
    %c0 = arith.constant 0 : index
    %c0_0 = arith.constant 0 : index
    %c0_1 = arith.constant 0 : index
    %0 = vector.load %arg1[%c0, %c0_0, %c0_1] : memref<1x72x256xf32, #tpu.memory_space<vmem>>, vector<1x72x256xf32>
    %1 = vector.shape_cast %0 : vector<1x72x256xf32> to vector<72x256xf32>
    %2 = arith.truncf %1 : vector<72x256xf32> to vector<72x256xbf16>
    %c0_2 = arith.constant 0 : index
    %c0_3 = arith.constant 0 : index
    %3 = vector.load %arg2[%c0_2, %c0_3] : memref<256x16xbf16, #tpu.memory_space<vmem>>, vector<256x16xbf16>
    %cst = arith.constant dense<0.000000e+00> : vector<72x16xf32>
    %4 = tpu.matmul %2, %3, %cst {dimension_numbers = #tpu.dot_dimension_numbers<[1], [0], [0], [1], [0, 0, 1, 1], [], []>} : vector<72x256xbf16>, vector<256x16xbf16>, vector<72x16xf32> -> vector<72x16xf32>
    %c0_4 = arith.constant 0 : index
    %c0_5 = arith.constant 0 : index
    %5 = vector.load %arg3[%c0_4, %c0_5] : memref<1x16xf32, #tpu.memory_space<vmem>>, vector<1x16xf32>
    %6 = vector.broadcast %5 : vector<1x16xf32> to vector<72x16xf32>
    %7 = arith.addf %4, %6 : vector<72x16xf32>
    %cst_6 = arith.constant 0.000000e+00 : f32
    %8 = vector.broadcast %cst_6 : f32 to vector<72x16xf32>
    %9 = arith.maximumf %7, %8 : vector<72x16xf32>
    %10 = vector.extract_strided_slice %9 {offsets = [0, 0], sizes = [2, 16], strides = [1, 1]} : vector<72x16xf32> to vector<2x16xf32>
    %11 = vector.extract_strided_slice %9 {offsets = [2, 0], sizes = [2, 16], strides = [1, 1]} : vector<72x16xf32> to vector<2x16xf32>
    %12 = vector.extract_strided_slice %9 {offsets = [4, 0], sizes = [2, 16], strides = [1, 1]} : vector<72x16xf32> to vector<2x16xf32>
    %13 = vector.extract_strided_slice %9 {offsets = [6, 0], sizes = [2, 16], strides = [1, 1]} : vector<72x16xf32> to vector<2x16xf32>
    %14 = vector.extract_strided_slice %9 {offsets = [8, 0], sizes = [2, 16], strides = [1, 1]} : vector<72x16xf32> to vector<2x16xf32>
    %15 = vector.extract_strided_slice %9 {offsets = [10, 0], sizes = [2, 16], strides = [1, 1]} : vector<72x16xf32> to vector<2x16xf32>
    %16 = vector.extract_strided_slice %9 {offsets = [12, 0], sizes = [2, 16], strides = [1, 1]} : vector<72x16xf32> to vector<2x16xf32>
    %17 = vector.extract_strided_slice %9 {offsets = [14, 0], sizes = [2, 16], strides = [1, 1]} : vector<72x16xf32> to vector<2x16xf32>
    %18 = vector.extract_strided_slice %9 {offsets = [16, 0], sizes = [2, 16], strides = [1, 1]} : vector<72x16xf32> to vector<2x16xf32>
    %19 = vector.extract_strided_slice %9 {offsets = [18, 0], sizes = [2, 16], strides = [1, 1]} : vector<72x16xf32> to vector<2x16xf32>
    %20 = vector.extract_strided_slice %9 {offsets = [20, 0], sizes = [2, 16], strides = [1, 1]} : vector<72x16xf32> to vector<2x16xf32>
    %21 = vector.extract_strided_slice %9 {offsets = [22, 0], sizes = [2, 16], strides = [1, 1]} : vector<72x16xf32> to vector<2x16xf32>
    %22 = vector.extract_strided_slice %9 {offsets = [24, 0], sizes = [2, 16], strides = [1, 1]} : vector<72x16xf32> to vector<2x16xf32>
    %23 = vector.extract_strided_slice %9 {offsets = [26, 0], sizes = [2, 16], strides = [1, 1]} : vector<72x16xf32> to vector<2x16xf32>
    %24 = vector.extract_strided_slice %9 {offsets = [28, 0], sizes = [2, 16], strides = [1, 1]} : vector<72x16xf32> to vector<2x16xf32>
    %25 = vector.extract_strided_slice %9 {offsets = [30, 0], sizes = [2, 16], strides = [1, 1]} : vector<72x16xf32> to vector<2x16xf32>
    %26 = vector.extract_strided_slice %9 {offsets = [32, 0], sizes = [2, 16], strides = [1, 1]} : vector<72x16xf32> to vector<2x16xf32>
    %27 = vector.extract_strided_slice %9 {offsets = [34, 0], sizes = [2, 16], strides = [1, 1]} : vector<72x16xf32> to vector<2x16xf32>
    %28 = vector.extract_strided_slice %9 {offsets = [36, 0], sizes = [2, 16], strides = [1, 1]} : vector<72x16xf32> to vector<2x16xf32>
    %29 = vector.extract_strided_slice %9 {offsets = [38, 0], sizes = [2, 16], strides = [1, 1]} : vector<72x16xf32> to vector<2x16xf32>
    %30 = vector.extract_strided_slice %9 {offsets = [40, 0], sizes = [2, 16], strides = [1, 1]} : vector<72x16xf32> to vector<2x16xf32>
    %31 = vector.extract_strided_slice %9 {offsets = [42, 0], sizes = [2, 16], strides = [1, 1]} : vector<72x16xf32> to vector<2x16xf32>
    %32 = vector.extract_strided_slice %9 {offsets = [44, 0], sizes = [2, 16], strides = [1, 1]} : vector<72x16xf32> to vector<2x16xf32>
    %33 = vector.extract_strided_slice %9 {offsets = [46, 0], sizes = [2, 16], strides = [1, 1]} : vector<72x16xf32> to vector<2x16xf32>
    %34 = vector.extract_strided_slice %9 {offsets = [48, 0], sizes = [2, 16], strides = [1, 1]} : vector<72x16xf32> to vector<2x16xf32>
    %35 = vector.extract_strided_slice %9 {offsets = [50, 0], sizes = [2, 16], strides = [1, 1]} : vector<72x16xf32> to vector<2x16xf32>
    %36 = vector.extract_strided_slice %9 {offsets = [52, 0], sizes = [2, 16], strides = [1, 1]} : vector<72x16xf32> to vector<2x16xf32>
    %37 = vector.extract_strided_slice %9 {offsets = [54, 0], sizes = [2, 16], strides = [1, 1]} : vector<72x16xf32> to vector<2x16xf32>
    %38 = vector.extract_strided_slice %9 {offsets = [56, 0], sizes = [2, 16], strides = [1, 1]} : vector<72x16xf32> to vector<2x16xf32>
    %39 = vector.extract_strided_slice %9 {offsets = [58, 0], sizes = [2, 16], strides = [1, 1]} : vector<72x16xf32> to vector<2x16xf32>
    %40 = vector.extract_strided_slice %9 {offsets = [60, 0], sizes = [2, 16], strides = [1, 1]} : vector<72x16xf32> to vector<2x16xf32>
    %41 = vector.extract_strided_slice %9 {offsets = [62, 0], sizes = [2, 16], strides = [1, 1]} : vector<72x16xf32> to vector<2x16xf32>
    %42 = vector.extract_strided_slice %9 {offsets = [64, 0], sizes = [2, 16], strides = [1, 1]} : vector<72x16xf32> to vector<2x16xf32>
    %43 = vector.extract_strided_slice %9 {offsets = [66, 0], sizes = [2, 16], strides = [1, 1]} : vector<72x16xf32> to vector<2x16xf32>
    %44 = vector.extract_strided_slice %9 {offsets = [68, 0], sizes = [2, 16], strides = [1, 1]} : vector<72x16xf32> to vector<2x16xf32>
    %45 = vector.extract_strided_slice %9 {offsets = [70, 0], sizes = [2, 16], strides = [1, 1]} : vector<72x16xf32> to vector<2x16xf32>
    %c0_7 = arith.constant 0 : index
    %c0_8 = arith.constant 0 : index
    %46 = vector.load %arg9[%c0_7, %c0_8] : memref<8x256xf32, #tpu.memory_space<vmem>>, vector<2x16xf32>
    tpu.vector_store %arg9[%c0_7, %c0_8], %10 {strides = array<i32>} : memref<8x256xf32, #tpu.memory_space<vmem>>, vector<2x16xf32>,
    %c0_9 = arith.constant 0 : index
    %c16 = arith.constant 16 : index
    %47 = vector.load %arg9[%c0_9, %c16] : memref<8x256xf32, #tpu.memory_space<vmem>>, vector<2x16xf32>
    tpu.vector_store %arg9[%c0_9, %c16], %11 {strides = array<i32>} : memref<8x256xf32, #tpu.memory_space<vmem>>, vector<2x16xf32>,
    %c0_10 = arith.constant 0 : index
    %c32 = arith.constant 32 : index
    %48 = vector.load %arg9[%c0_10, %c32] : memref<8x256xf32, #tpu.memory_space<vmem>>, vector<2x16xf32>
    tpu.vector_store %arg9[%c0_10, %c32], %12 {strides = array<i32>} : memref<8x256xf32, #tpu.memory_space<vmem>>, vector<2x16xf32>,
    %c0_11 = arith.constant 0 : index
    %c48 = arith.constant 48 : index
    %49 = vector.load %arg9[%c0_11, %c48] : memref<8x256xf32, #tpu.memory_space<vmem>>, vector<2x16xf32>
    tpu.vector_store %arg9[%c0_11, %c48], %13 {strides = array<i32>} : memref<8x256xf32, #tpu.memory_space<vmem>>, vector<2x16xf32>,
    %c0_12 = arith.constant 0 : index
    %c64 = arith.constant 64 : index
    %50 = vector.load %arg9[%c0_12, %c64] : memref<8x256xf32, #tpu.memory_space<vmem>>, vector<2x16xf32>
    tpu.vector_store %arg9[%c0_12, %c64], %16 {strides = array<i32>} : memref<8x256xf32, #tpu.memory_space<vmem>>, vector<2x16xf32>,
    %c0_13 = arith.constant 0 : index
    %c80 = arith.constant 80 : index
    %51 = vector.load %arg9[%c0_13, %c80] : memref<8x256xf32, #tpu.memory_space<vmem>>, vector<2x16xf32>
    tpu.vector_store %arg9[%c0_13, %c80], %17 {strides = array<i32>} : memref<8x256xf32, #tpu.memory_space<vmem>>, vector<2x16xf32>,
    %c0_14 = arith.constant 0 : index
    %c96 = arith.constant 96 : index
    %52 = vector.load %arg9[%c0_14, %c96] : memref<8x256xf32, #tpu.memory_space<vmem>>, vector<2x16xf32>
    tpu.vector_store %arg9[%c0_14, %c96], %18 {strides = array<i32>} : memref<8x256xf32, #tpu.memory_space<vmem>>, vector<2x16xf32>,
    %c0_15 = arith.constant 0 : index
    %c112 = arith.constant 112 : index
    %53 = vector.load %arg9[%c0_15, %c112] : memref<8x256xf32, #tpu.memory_space<vmem>>, vector<2x16xf32>
    tpu.vector_store %arg9[%c0_15, %c112], %19 {strides = array<i32>} : memref<8x256xf32, #tpu.memory_space<vmem>>, vector<2x16xf32>,
    %c0_16 = arith.constant 0 : index
    %c128 = arith.constant 128 : index
    %54 = vector.load %arg9[%c0_16, %c128] : memref<8x256xf32, #tpu.memory_space<vmem>>, vector<2x16xf32>
    tpu.vector_store %arg9[%c0_16, %c128], %22 {strides = array<i32>} : memref<8x256xf32, #tpu.memory_space<vmem>>, vector<2x16xf32>,
    %c0_17 = arith.constant 0 : index
    %c144 = arith.constant 144 : index
    %55 = vector.load %arg9[%c0_17, %c144] : memref<8x256xf32, #tpu.memory_space<vmem>>, vector<2x16xf32>
    tpu.vector_store %arg9[%c0_17, %c144], %23 {strides = array<i32>} : memref<8x256xf32, #tpu.memory_space<vmem>>, vector<2x16xf32>,
    %c0_18 = arith.constant 0 : index
    %c160 = arith.constant 160 : index
    %56 = vector.load %arg9[%c0_18, %c160] : memref<8x256xf32, #tpu.memory_space<vmem>>, vector<2x16xf32>
    tpu.vector_store %arg9[%c0_18, %c160], %24 {strides = array<i32>} : memref<8x256xf32, #tpu.memory_space<vmem>>, vector<2x16xf32>,
    %c0_19 = arith.constant 0 : index
    %c176 = arith.constant 176 : index
    %57 = vector.load %arg9[%c0_19, %c176] : memref<8x256xf32, #tpu.memory_space<vmem>>, vector<2x16xf32>
    tpu.vector_store %arg9[%c0_19, %c176], %25 {strides = array<i32>} : memref<8x256xf32, #tpu.memory_space<vmem>>, vector<2x16xf32>,
    %c0_20 = arith.constant 0 : index
    %c192 = arith.constant 192 : index
    %58 = vector.load %arg9[%c0_20, %c192] : memref<8x256xf32, #tpu.memory_space<vmem>>, vector<2x16xf32>
    tpu.vector_store %arg9[%c0_20, %c192], %28 {strides = array<i32>} : memref<8x256xf32, #tpu.memory_space<vmem>>, vector<2x16xf32>,
    %c0_21 = arith.constant 0 : index
    %c208 = arith.constant 208 : index
    %59 = vector.load %arg9[%c0_21, %c208] : memref<8x256xf32, #tpu.memory_space<vmem>>, vector<2x16xf32>
    tpu.vector_store %arg9[%c0_21, %c208], %29 {strides = array<i32>} : memref<8x256xf32, #tpu.memory_space<vmem>>, vector<2x16xf32>,
    %c0_22 = arith.constant 0 : index
    %c224 = arith.constant 224 : index
    %60 = vector.load %arg9[%c0_22, %c224] : memref<8x256xf32, #tpu.memory_space<vmem>>, vector<2x16xf32>
    tpu.vector_store %arg9[%c0_22, %c224], %30 {strides = array<i32>} : memref<8x256xf32, #tpu.memory_space<vmem>>, vector<2x16xf32>,
    %c0_23 = arith.constant 0 : index
    %c240 = arith.constant 240 : index
    %61 = vector.load %arg9[%c0_23, %c240] : memref<8x256xf32, #tpu.memory_space<vmem>>, vector<2x16xf32>
    tpu.vector_store %arg9[%c0_23, %c240], %31 {strides = array<i32>} : memref<8x256xf32, #tpu.memory_space<vmem>>, vector<2x16xf32>,
    %c2 = arith.constant 2 : index
    %c0_24 = arith.constant 0 : index
    %62 = vector.load %arg9[%c2, %c0_24] : memref<8x256xf32, #tpu.memory_space<vmem>>, vector<2x16xf32>
    tpu.vector_store %arg9[%c2, %c0_24], %12 {strides = array<i32>} : memref<8x256xf32, #tpu.memory_space<vmem>>, vector<2x16xf32>,
    %c2_25 = arith.constant 2 : index
    %c16_26 = arith.constant 16 : index
    %63 = vector.load %arg9[%c2_25, %c16_26] : memref<8x256xf32, #tpu.memory_space<vmem>>, vector<2x16xf32>
    tpu.vector_store %arg9[%c2_25, %c16_26], %13 {strides = array<i32>} : memref<8x256xf32, #tpu.memory_space<vmem>>, vector<2x16xf32>,
    %c2_27 = arith.constant 2 : index
    %c32_28 = arith.constant 32 : index
    %64 = vector.load %arg9[%c2_27, %c32_28] : memref<8x256xf32, #tpu.memory_space<vmem>>, vector<2x16xf32>
    tpu.vector_store %arg9[%c2_27, %c32_28], %14 {strides = array<i32>} : memref<8x256xf32, #tpu.memory_space<vmem>>, vector<2x16xf32>,
    %c2_29 = arith.constant 2 : index
    %c48_30 = arith.constant 48 : index
    %65 = vector.load %arg9[%c2_29, %c48_30] : memref<8x256xf32, #tpu.memory_space<vmem>>, vector<2x16xf32>
    tpu.vector_store %arg9[%c2_29, %c48_30], %15 {strides = array<i32>} : memref<8x256xf32, #tpu.memory_space<vmem>>, vector<2x16xf32>,
    %c2_31 = arith.constant 2 : index
    %c64_32 = arith.constant 64 : index
    %66 = vector.load %arg9[%c2_31, %c64_32] : memref<8x256xf32, #tpu.memory_space<vmem>>, vector<2x16xf32>
    tpu.vector_store %arg9[%c2_31, %c64_32], %18 {strides = array<i32>} : memref<8x256xf32, #tpu.memory_space<vmem>>, vector<2x16xf32>,
    %c2_33 = arith.constant 2 : index
    %c80_34 = arith.constant 80 : index
    %67 = vector.load %arg9[%c2_33, %c80_34] : memref<8x256xf32, #tpu.memory_space<vmem>>, vector<2x16xf32>
    tpu.vector_store %arg9[%c2_33, %c80_34], %19 {strides = array<i32>} : memref<8x256xf32, #tpu.memory_space<vmem>>, vector<2x16xf32>,
    %c2_35 = arith.constant 2 : index
    %c96_36 = arith.constant 96 : index
    %68 = vector.load %arg9[%c2_35, %c96_36] : memref<8x256xf32, #tpu.memory_space<vmem>>, vector<2x16xf32>
    tpu.vector_store %arg9[%c2_35, %c96_36], %20 {strides = array<i32>} : memref<8x256xf32, #tpu.memory_space<vmem>>, vector<2x16xf32>,
    %c2_37 = arith.constant 2 : index
    %c112_38 = arith.constant 112 : index
    %69 = vector.load %arg9[%c2_37, %c112_38] : memref<8x256xf32, #tpu.memory_space<vmem>>, vector<2x16xf32>
    tpu.vector_store %arg9[%c2_37, %c112_38], %21 {strides = array<i32>} : memref<8x256xf32, #tpu.memory_space<vmem>>, vector<2x16xf32>,
    %c2_39 = arith.constant 2 : index
    %c128_40 = arith.constant 128 : index
    %70 = vector.load %arg9[%c2_39, %c128_40] : memref<8x256xf32, #tpu.memory_space<vmem>>, vector<2x16xf32>
    tpu.vector_store %arg9[%c2_39, %c128_40], %24 {strides = array<i32>} : memref<8x256xf32, #tpu.memory_space<vmem>>, vector<2x16xf32>,
    %c2_41 = arith.constant 2 : index
    %c144_42 = arith.constant 144 : index
    %71 = vector.load %arg9[%c2_41, %c144_42] : memref<8x256xf32, #tpu.memory_space<vmem>>, vector<2x16xf32>
    tpu.vector_store %arg9[%c2_41, %c144_42], %25 {strides = array<i32>} : memref<8x256xf32, #tpu.memory_space<vmem>>, vector<2x16xf32>,
    %c2_43 = arith.constant 2 : index
    %c160_44 = arith.constant 160 : index
    %72 = vector.load %arg9[%c2_43, %c160_44] : memref<8x256xf32, #tpu.memory_space<vmem>>, vector<2x16xf32>
    tpu.vector_store %arg9[%c2_43, %c160_44], %26 {strides = array<i32>} : memref<8x256xf32, #tpu.memory_space<vmem>>, vector<2x16xf32>,
    %c2_45 = arith.constant 2 : index
    %c176_46 = arith.constant 176 : index
    %73 = vector.load %arg9[%c2_45, %c176_46] : memref<8x256xf32, #tpu.memory_space<vmem>>, vector<2x16xf32>
    tpu.vector_store %arg9[%c2_45, %c176_46], %27 {strides = array<i32>} : memref<8x256xf32, #tpu.memory_space<vmem>>, vector<2x16xf32>,
    %c2_47 = arith.constant 2 : index
    %c192_48 = arith.constant 192 : index
    %74 = vector.load %arg9[%c2_47, %c192_48] : memref<8x256xf32, #tpu.memory_space<vmem>>, vector<2x16xf32>
    tpu.vector_store %arg9[%c2_47, %c192_48], %30 {strides = array<i32>} : memref<8x256xf32, #tpu.memory_space<vmem>>, vector<2x16xf32>,
    %c2_49 = arith.constant 2 : index
    %c208_50 = arith.constant 208 : index
    %75 = vector.load %arg9[%c2_49, %c208_50] : memref<8x256xf32, #tpu.memory_space<vmem>>, vector<2x16xf32>
    tpu.vector_store %arg9[%c2_49, %c208_50], %31 {strides = array<i32>} : memref<8x256xf32, #tpu.memory_space<vmem>>, vector<2x16xf32>,
    %c2_51 = arith.constant 2 : index
    %c224_52 = arith.constant 224 : index
    %76 = vector.load %arg9[%c2_51, %c224_52] : memref<8x256xf32, #tpu.memory_space<vmem>>, vector<2x16xf32>
    tpu.vector_store %arg9[%c2_51, %c224_52], %32 {strides = array<i32>} : memref<8x256xf32, #tpu.memory_space<vmem>>, vector<2x16xf32>,
    %c2_53 = arith.constant 2 : index
    %c240_54 = arith.constant 240 : index
    %77 = vector.load %arg9[%c2_53, %c240_54] : memref<8x256xf32, #tpu.memory_space<vmem>>, vector<2x16xf32>
    tpu.vector_store %arg9[%c2_53, %c240_54], %33 {strides = array<i32>} : memref<8x256xf32, #tpu.memory_space<vmem>>, vector<2x16xf32>,
    %c4 = arith.constant 4 : index
    %c0_55 = arith.constant 0 : index
    %78 = vector.load %arg9[%c4, %c0_55] : memref<8x256xf32, #tpu.memory_space<vmem>>, vector<2x16xf32>
    tpu.vector_store %arg9[%c4, %c0_55], %22 {strides = array<i32>} : memref<8x256xf32, #tpu.memory_space<vmem>>, vector<2x16xf32>,
    %c4_56 = arith.constant 4 : index
    %c16_57 = arith.constant 16 : index
    %79 = vector.load %arg9[%c4_56, %c16_57] : memref<8x256xf32, #tpu.memory_space<vmem>>, vector<2x16xf32>
    tpu.vector_store %arg9[%c4_56, %c16_57], %23 {strides = array<i32>} : memref<8x256xf32, #tpu.memory_space<vmem>>, vector<2x16xf32>,
    %c4_58 = arith.constant 4 : index
    %c32_59 = arith.constant 32 : index
    %80 = vector.load %arg9[%c4_58, %c32_59] : memref<8x256xf32, #tpu.memory_space<vmem>>, vector<2x16xf32>
    tpu.vector_store %arg9[%c4_58, %c32_59], %24 {strides = array<i32>} : memref<8x256xf32, #tpu.memory_space<vmem>>, vector<2x16xf32>,
    %c4_60 = arith.constant 4 : index
    %c48_61 = arith.constant 48 : index
    %81 = vector.load %arg9[%c4_60, %c48_61] : memref<8x256xf32, #tpu.memory_space<vmem>>, vector<2x16xf32>
    tpu.vector_store %arg9[%c4_60, %c48_61], %25 {strides = array<i32>} : memref<8x256xf32, #tpu.memory_space<vmem>>, vector<2x16xf32>,
    %c4_62 = arith.constant 4 : index
    %c64_63 = arith.constant 64 : index
    %82 = vector.load %arg9[%c4_62, %c64_63] : memref<8x256xf32, #tpu.memory_space<vmem>>, vector<2x16xf32>
    tpu.vector_store %arg9[%c4_62, %c64_63], %28 {strides = array<i32>} : memref<8x256xf32, #tpu.memory_space<vmem>>, vector<2x16xf32>,
    %c4_64 = arith.constant 4 : index
    %c80_65 = arith.constant 80 : index
    %83 = vector.load %arg9[%c4_64, %c80_65] : memref<8x256xf32, #tpu.memory_space<vmem>>, vector<2x16xf32>
    tpu.vector_store %arg9[%c4_64, %c80_65], %29 {strides = array<i32>} : memref<8x256xf32, #tpu.memory_space<vmem>>, vector<2x16xf32>,
    %c4_66 = arith.constant 4 : index
    %c96_67 = arith.constant 96 : index
    %84 = vector.load %arg9[%c4_66, %c96_67] : memref<8x256xf32, #tpu.memory_space<vmem>>, vector<2x16xf32>
    tpu.vector_store %arg9[%c4_66, %c96_67], %30 {strides = array<i32>} : memref<8x256xf32, #tpu.memory_space<vmem>>, vector<2x16xf32>,
    %c4_68 = arith.constant 4 : index
    %c112_69 = arith.constant 112 : index
    %85 = vector.load %arg9[%c4_68, %c112_69] : memref<8x256xf32, #tpu.memory_space<vmem>>, vector<2x16xf32>
    tpu.vector_store %arg9[%c4_68, %c112_69], %31 {strides = array<i32>} : memref<8x256xf32, #tpu.memory_space<vmem>>, vector<2x16xf32>,
    %c4_70 = arith.constant 4 : index
    %c128_71 = arith.constant 128 : index
    %86 = vector.load %arg9[%c4_70, %c128_71] : memref<8x256xf32, #tpu.memory_space<vmem>>, vector<2x16xf32>
    tpu.vector_store %arg9[%c4_70, %c128_71], %34 {strides = array<i32>} : memref<8x256xf32, #tpu.memory_space<vmem>>, vector<2x16xf32>,
    %c4_72 = arith.constant 4 : index
    %c144_73 = arith.constant 144 : index
    %87 = vector.load %arg9[%c4_72, %c144_73] : memref<8x256xf32, #tpu.memory_space<vmem>>, vector<2x16xf32>
    tpu.vector_store %arg9[%c4_72, %c144_73], %35 {strides = array<i32>} : memref<8x256xf32, #tpu.memory_space<vmem>>, vector<2x16xf32>,
    %c4_74 = arith.constant 4 : index
    %c160_75 = arith.constant 160 : index
    %88 = vector.load %arg9[%c4_74, %c160_75] : memref<8x256xf32, #tpu.memory_space<vmem>>, vector<2x16xf32>
    tpu.vector_store %arg9[%c4_74, %c160_75], %36 {strides = array<i32>} : memref<8x256xf32, #tpu.memory_space<vmem>>, vector<2x16xf32>,
    %c4_76 = arith.constant 4 : index
    %c176_77 = arith.constant 176 : index
    %89 = vector.load %arg9[%c4_76, %c176_77] : memref<8x256xf32, #tpu.memory_space<vmem>>, vector<2x16xf32>
    tpu.vector_store %arg9[%c4_76, %c176_77], %37 {strides = array<i32>} : memref<8x256xf32, #tpu.memory_space<vmem>>, vector<2x16xf32>,
    %c4_78 = arith.constant 4 : index
    %c192_79 = arith.constant 192 : index
    %90 = vector.load %arg9[%c4_78, %c192_79] : memref<8x256xf32, #tpu.memory_space<vmem>>, vector<2x16xf32>
    tpu.vector_store %arg9[%c4_78, %c192_79], %40 {strides = array<i32>} : memref<8x256xf32, #tpu.memory_space<vmem>>, vector<2x16xf32>,
    %c4_80 = arith.constant 4 : index
    %c208_81 = arith.constant 208 : index
    %91 = vector.load %arg9[%c4_80, %c208_81] : memref<8x256xf32, #tpu.memory_space<vmem>>, vector<2x16xf32>
    tpu.vector_store %arg9[%c4_80, %c208_81], %41 {strides = array<i32>} : memref<8x256xf32, #tpu.memory_space<vmem>>, vector<2x16xf32>,
    %c4_82 = arith.constant 4 : index
    %c224_83 = arith.constant 224 : index
    %92 = vector.load %arg9[%c4_82, %c224_83] : memref<8x256xf32, #tpu.memory_space<vmem>>, vector<2x16xf32>
    tpu.vector_store %arg9[%c4_82, %c224_83], %42 {strides = array<i32>} : memref<8x256xf32, #tpu.memory_space<vmem>>, vector<2x16xf32>,
    %c4_84 = arith.constant 4 : index
    %c240_85 = arith.constant 240 : index
    %93 = vector.load %arg9[%c4_84, %c240_85] : memref<8x256xf32, #tpu.memory_space<vmem>>, vector<2x16xf32>
    tpu.vector_store %arg9[%c4_84, %c240_85], %43 {strides = array<i32>} : memref<8x256xf32, #tpu.memory_space<vmem>>, vector<2x16xf32>,
    %c6 = arith.constant 6 : index
    %c0_86 = arith.constant 0 : index
    %94 = vector.load %arg9[%c6, %c0_86] : memref<8x256xf32, #tpu.memory_space<vmem>>, vector<2x16xf32>
    tpu.vector_store %arg9[%c6, %c0_86], %24 {strides = array<i32>} : memref<8x256xf32, #tpu.memory_space<vmem>>, vector<2x16xf32>,
    %c6_87 = arith.constant 6 : index
    %c16_88 = arith.constant 16 : index
    %95 = vector.load %arg9[%c6_87, %c16_88] : memref<8x256xf32, #tpu.memory_space<vmem>>, vector<2x16xf32>
    tpu.vector_store %arg9[%c6_87, %c16_88], %25 {strides = array<i32>} : memref<8x256xf32, #tpu.memory_space<vmem>>, vector<2x16xf32>,
    %c6_89 = arith.constant 6 : index
    %c32_90 = arith.constant 32 : index
    %96 = vector.load %arg9[%c6_89, %c32_90] : memref<8x256xf32, #tpu.memory_space<vmem>>, vector<2x16xf32>
    tpu.vector_store %arg9[%c6_89, %c32_90], %26 {strides = array<i32>} : memref<8x256xf32, #tpu.memory_space<vmem>>, vector<2x16xf32>,
    %c6_91 = arith.constant 6 : index
    %c48_92 = arith.constant 48 : index
    %97 = vector.load %arg9[%c6_91, %c48_92] : memref<8x256xf32, #tpu.memory_space<vmem>>, vector<2x16xf32>
    tpu.vector_store %arg9[%c6_91, %c48_92], %27 {strides = array<i32>} : memref<8x256xf32, #tpu.memory_space<vmem>>, vector<2x16xf32>,
    %c6_93 = arith.constant 6 : index
    %c64_94 = arith.constant 64 : index
    %98 = vector.load %arg9[%c6_93, %c64_94] : memref<8x256xf32, #tpu.memory_space<vmem>>, vector<2x16xf32>
    tpu.vector_store %arg9[%c6_93, %c64_94], %30 {strides = array<i32>} : memref<8x256xf32, #tpu.memory_space<vmem>>, vector<2x16xf32>,
    %c6_95 = arith.constant 6 : index
    %c80_96 = arith.constant 80 : index
    %99 = vector.load %arg9[%c6_95, %c80_96] : memref<8x256xf32, #tpu.memory_space<vmem>>, vector<2x16xf32>
    tpu.vector_store %arg9[%c6_95, %c80_96], %31 {strides = array<i32>} : memref<8x256xf32, #tpu.memory_space<vmem>>, vector<2x16xf32>,
    %c6_97 = arith.constant 6 : index
    %c96_98 = arith.constant 96 : index
    %100 = vector.load %arg9[%c6_97, %c96_98] : memref<8x256xf32, #tpu.memory_space<vmem>>, vector<2x16xf32>
    tpu.vector_store %arg9[%c6_97, %c96_98], %32 {strides = array<i32>} : memref<8x256xf32, #tpu.memory_space<vmem>>, vector<2x16xf32>,
    %c6_99 = arith.constant 6 : index
    %c112_100 = arith.constant 112 : index
    %101 = vector.load %arg9[%c6_99, %c112_100] : memref<8x256xf32, #tpu.memory_space<vmem>>, vector<2x16xf32>
    tpu.vector_store %arg9[%c6_99, %c112_100], %33 {strides = array<i32>} : memref<8x256xf32, #tpu.memory_space<vmem>>, vector<2x16xf32>,
    %c6_101 = arith.constant 6 : index
    %c128_102 = arith.constant 128 : index
    %102 = vector.load %arg9[%c6_101, %c128_102] : memref<8x256xf32, #tpu.memory_space<vmem>>, vector<2x16xf32>
    tpu.vector_store %arg9[%c6_101, %c128_102], %36 {strides = array<i32>} : memref<8x256xf32, #tpu.memory_space<vmem>>, vector<2x16xf32>,
    %c6_103 = arith.constant 6 : index
    %c144_104 = arith.constant 144 : index
    %103 = vector.load %arg9[%c6_103, %c144_104] : memref<8x256xf32, #tpu.memory_space<vmem>>, vector<2x16xf32>
    tpu.vector_store %arg9[%c6_103, %c144_104], %37 {strides = array<i32>} : memref<8x256xf32, #tpu.memory_space<vmem>>, vector<2x16xf32>,
    %c6_105 = arith.constant 6 : index
    %c160_106 = arith.constant 160 : index
    %104 = vector.load %arg9[%c6_105, %c160_106] : memref<8x256xf32, #tpu.memory_space<vmem>>, vector<2x16xf32>
    tpu.vector_store %arg9[%c6_105, %c160_106], %38 {strides = array<i32>} : memref<8x256xf32, #tpu.memory_space<vmem>>, vector<2x16xf32>,
    %c6_107 = arith.constant 6 : index
    %c176_108 = arith.constant 176 : index
    %105 = vector.load %arg9[%c6_107, %c176_108] : memref<8x256xf32, #tpu.memory_space<vmem>>, vector<2x16xf32>
    tpu.vector_store %arg9[%c6_107, %c176_108], %39 {strides = array<i32>} : memref<8x256xf32, #tpu.memory_space<vmem>>, vector<2x16xf32>,
    %c6_109 = arith.constant 6 : index
    %c192_110 = arith.constant 192 : index
    %106 = vector.load %arg9[%c6_109, %c192_110] : memref<8x256xf32, #tpu.memory_space<vmem>>, vector<2x16xf32>
    tpu.vector_store %arg9[%c6_109, %c192_110], %42 {strides = array<i32>} : memref<8x256xf32, #tpu.memory_space<vmem>>, vector<2x16xf32>,
    %c6_111 = arith.constant 6 : index
    %c208_112 = arith.constant 208 : index
    %107 = vector.load %arg9[%c6_111, %c208_112] : memref<8x256xf32, #tpu.memory_space<vmem>>, vector<2x16xf32>
    tpu.vector_store %arg9[%c6_111, %c208_112], %43 {strides = array<i32>} : memref<8x256xf32, #tpu.memory_space<vmem>>, vector<2x16xf32>,
    %c6_113 = arith.constant 6 : index
    %c224_114 = arith.constant 224 : index
    %108 = vector.load %arg9[%c6_113, %c224_114] : memref<8x256xf32, #tpu.memory_space<vmem>>, vector<2x16xf32>
    tpu.vector_store %arg9[%c6_113, %c224_114], %44 {strides = array<i32>} : memref<8x256xf32, #tpu.memory_space<vmem>>, vector<2x16xf32>,
    %c6_115 = arith.constant 6 : index
    %c240_116 = arith.constant 240 : index
    %109 = vector.load %arg9[%c6_115, %c240_116] : memref<8x256xf32, #tpu.memory_space<vmem>>, vector<2x16xf32>
    tpu.vector_store %arg9[%c6_115, %c240_116], %45 {strides = array<i32>} : memref<8x256xf32, #tpu.memory_space<vmem>>, vector<2x16xf32>,
    %c0_117 = arith.constant 0 : index
    %c0_118 = arith.constant 0 : index
    %110 = vector.load %arg9[%c0_117, %c0_118] : memref<8x256xf32, #tpu.memory_space<vmem>>, vector<8x256xf32>
    %111 = arith.truncf %110 : vector<8x256xf32> to vector<8x256xbf16>
    %c0_119 = arith.constant 0 : index
    %c0_120 = arith.constant 0 : index
    %112 = vector.load %arg4[%c0_119, %c0_120] : memref<256x16xbf16, #tpu.memory_space<vmem>>, vector<256x16xbf16>
    %cst_121 = arith.constant dense<0.000000e+00> : vector<8x16xf32>
    %113 = tpu.matmul %111, %112, %cst_121 {dimension_numbers = #tpu.dot_dimension_numbers<[1], [0], [0], [1], [0, 0, 1, 1], [], []>} : vector<8x256xbf16>, vector<256x16xbf16>, vector<8x16xf32> -> vector<8x16xf32>
    %c0_122 = arith.constant 0 : index
    %c0_123 = arith.constant 0 : index
    %114 = vector.load %arg5[%c0_122, %c0_123] : memref<1x16xf32, #tpu.memory_space<vmem>>, vector<1x16xf32>
    %115 = vector.broadcast %114 : vector<1x16xf32> to vector<8x16xf32>
    %116 = arith.addf %113, %115 : vector<8x16xf32>
    %cst_124 = arith.constant 0.000000e+00 : f32
    %117 = vector.broadcast %cst_124 : f32 to vector<8x16xf32>
    %118 = arith.maximumf %116, %117 : vector<8x16xf32>
    %119 = vector.extract_strided_slice %118 {offsets = [0, 0], sizes = [2, 16], strides = [1, 1]} : vector<8x16xf32> to vector<2x16xf32>
    %c0_125 = arith.constant 0 : index
    %c0_126 = arith.constant 0 : index
    %120 = vector.load %arg10[%c0_125, %c0_126] : memref<2x64xf32, #tpu.memory_space<vmem>>, vector<2x16xf32>
    tpu.vector_store %arg10[%c0_125, %c0_126], %119 {strides = array<i32>} : memref<2x64xf32, #tpu.memory_space<vmem>>, vector<2x16xf32>,
    %121 = vector.extract_strided_slice %118 {offsets = [2, 0], sizes = [2, 16], strides = [1, 1]} : vector<8x16xf32> to vector<2x16xf32>
    %c0_127 = arith.constant 0 : index
    %c16_128 = arith.constant 16 : index
    %122 = vector.load %arg10[%c0_127, %c16_128] : memref<2x64xf32, #tpu.memory_space<vmem>>, vector<2x16xf32>
    tpu.vector_store %arg10[%c0_127, %c16_128], %121 {strides = array<i32>} : memref<2x64xf32, #tpu.memory_space<vmem>>, vector<2x16xf32>,
    %123 = vector.extract_strided_slice %118 {offsets = [4, 0], sizes = [2, 16], strides = [1, 1]} : vector<8x16xf32> to vector<2x16xf32>
    %c0_129 = arith.constant 0 : index
    %c32_130 = arith.constant 32 : index
    %124 = vector.load %arg10[%c0_129, %c32_130] : memref<2x64xf32, #tpu.memory_space<vmem>>, vector<2x16xf32>
    tpu.vector_store %arg10[%c0_129, %c32_130], %123 {strides = array<i32>} : memref<2x64xf32, #tpu.memory_space<vmem>>, vector<2x16xf32>,
    %125 = vector.extract_strided_slice %118 {offsets = [6, 0], sizes = [2, 16], strides = [1, 1]} : vector<8x16xf32> to vector<2x16xf32>
    %c0_131 = arith.constant 0 : index
    %c48_132 = arith.constant 48 : index
    %126 = vector.load %arg10[%c0_131, %c48_132] : memref<2x64xf32, #tpu.memory_space<vmem>>, vector<2x16xf32>
    tpu.vector_store %arg10[%c0_131, %c48_132], %125 {strides = array<i32>} : memref<2x64xf32, #tpu.memory_space<vmem>>, vector<2x16xf32>,
    %c0_133 = arith.constant 0 : index
    %c0_134 = arith.constant 0 : index
    %127 = vector.load %arg10[%c0_133, %c0_134] : memref<2x64xf32, #tpu.memory_space<vmem>>, vector<2x64xf32>
    %128 = arith.truncf %127 : vector<2x64xf32> to vector<2x64xbf16>
    %c0_135 = arith.constant 0 : index
    %c0_136 = arith.constant 0 : index
    %129 = vector.load %arg6[%c0_135, %c0_136] : memref<64x64xbf16, #tpu.memory_space<vmem>>, vector<64x64xbf16>
    %cst_137 = arith.constant dense<0.000000e+00> : vector<2x64xf32>
    %130 = tpu.matmul %128, %129, %cst_137 {dimension_numbers = #tpu.dot_dimension_numbers<[1], [0], [0], [1], [0, 0, 1, 1], [], []>} : vector<2x64xbf16>, vector<64x64xbf16>, vector<2x64xf32> -> vector<2x64xf32>
    %c0_138 = arith.constant 0 : index
    %c0_139 = arith.constant 0 : index
    %131 = vector.load %arg7[%c0_138, %c0_139] : memref<1x64xf32, #tpu.memory_space<vmem>>, vector<1x64xf32>
    %132 = vector.broadcast %131 : vector<1x64xf32> to vector<2x64xf32>
    %133 = arith.addf %130, %132 : vector<2x64xf32>
    %cst_140 = arith.constant 0.000000e+00 : f32
    %134 = vector.broadcast %cst_140 : f32 to vector<2x64xf32>
    %135 = arith.maximumf %133, %134 : vector<2x64xf32>
    %c0_141 = arith.constant 0 : index
    %c0_142 = arith.constant 0 : index
    %c0_143 = arith.constant 0 : index
    %136 = vector.load %arg8[%c0_141, %c0_142, %c0_143] : memref<1x2x64xf32, #tpu.memory_space<vmem>>, vector<1x2x64xf32>
    %137 = vector.shape_cast %136 : vector<1x2x64xf32> to vector<2x64xf32>
    %138 = vector.shape_cast %135 : vector<2x64xf32> to vector<1x2x64xf32>
    tpu.vector_store %arg8[%c0_141, %c0_142, %c0_143], %138 {strides = array<i32>} : memref<1x2x64xf32, #tpu.memory_space<vmem>>, vector<1x2x64xf32>,
    return
  }
  func.func @transform_0(%arg0: i32) -> (i32, i32, i32) {
    %c0_i32 = arith.constant 0 : i32
    %c0_i32_0 = arith.constant 0 : i32
    %c0_i32_1 = arith.constant 0 : i32
    return %arg0, %c0_i32, %c0_i32_0 : i32, i32, i32
  }
  func.func @transform_1(%arg0: i32) -> (i32, i32) {
    %c0_i32 = arith.constant 0 : i32
    %c0_i32_0 = arith.constant 0 : i32
    %c0_i32_1 = arith.constant 0 : i32
    return %c0_i32, %c0_i32_0 : i32, i32
  }
  func.func @transform_2(%arg0: i32) -> (i32, i32) {
    %c0_i32 = arith.constant 0 : i32
    %c0_i32_0 = arith.constant 0 : i32
    %c0_i32_1 = arith.constant 0 : i32
    return %c0_i32, %c0_i32_0 : i32, i32
  }
  func.func @transform_3(%arg0: i32) -> (i32, i32) {
    %c0_i32 = arith.constant 0 : i32
    %c0_i32_0 = arith.constant 0 : i32
    %c0_i32_1 = arith.constant 0 : i32
    return %c0_i32, %c0_i32_0 : i32, i32
  }
  func.func @transform_4(%arg0: i32) -> (i32, i32) {
    %c0_i32 = arith.constant 0 : i32
    %c0_i32_0 = arith.constant 0 : i32
    %c0_i32_1 = arith.constant 0 : i32
    return %c0_i32, %c0_i32_0 : i32, i32
  }
  func.func @transform_5(%arg0: i32) -> (i32, i32) {
    %c0_i32 = arith.constant 0 : i32
    %c0_i32_0 = arith.constant 0 : i32
    %c0_i32_1 = arith.constant 0 : i32
    return %c0_i32, %c0_i32_0 : i32, i32
  }
  func.func @transform_6(%arg0: i32) -> (i32, i32) {
    %c0_i32 = arith.constant 0 : i32
    %c0_i32_0 = arith.constant 0 : i32
    %c0_i32_1 = arith.constant 0 : i32
    return %c0_i32, %c0_i32_0 : i32, i32
  }
  func.func @transform_7(%arg0: i32) -> (i32, i32, i32) {
    %c0_i32 = arith.constant 0 : i32
    %c0_i32_0 = arith.constant 0 : i32
    %c0_i32_1 = arith.constant 0 : i32
    return %arg0, %c0_i32, %c0_i32_0 : i32, i32, i32
  }
}

</mosaic_0001>

<bundles_post_ra>
// kernel: obs_network_forward.1
= control target key start
LH: loop header
LB: loop body
LE: loop exit
PB: predicated region body
PF: predicated region fallthrough
CT: control target
= control target key end

     0   :  { %12 = vsyncpa [#allocation5], 0  ;;  %s1918_s0 = inlined_call_operand.vmem [shape: f32[2,72,256], index: 0, kind: input, shape index: {}]   ;;  %s1919_s1 = inlined_call_operand.vmem [shape: bf16[256,16], index: 1, kind: input, shape index: {}]   ;;  %s1920_s2 = inlined_call_operand.vmem [shape: f32[1,16], index: 2, kind: input, shape index: {}]   ;;  %s1921_s3 = inlined_call_operand.vmem [shape: bf16[256,16], index: 3, kind: input, shape index: {}]   ;;  %s1922_s4 = inlined_call_operand.vmem [shape: f32[1,16], index: 4, kind: input, shape index: {}]   ;;  %s1923_s5 = inlined_call_operand.vmem [shape: bf16[64,64], index: 5, kind: input, shape index: {}]   ;;  %s1924_s6 = inlined_call_operand.vmem [shape: f32[1,64], index: 6, kind: input, shape index: {}]   ;;  %s1925_s7 = inlined_call_operand.hbm [shape: f32[2,2,64], index: 7, kind: output, shape index: {}]  }
   0x1   :  { %14 = vsyncpa [#allocation5 + $0x1], 0  ;;  %s1515_s24 = smov 0   ;;  %s1517_s25 = smov 0  }
   0x2   :  { %s1519_s26 = smov 0   ;;  %s1521_s27 = smov 0  }
   0x3 LB: > { %s1536_s28 = sadd.s32 4294967295, %s1463_s27   ;;  %s1181_s29 = sadd.s32 4294967294, %s1463_s27   ;;  %s1463_s27 = sphi %s1521_s27, %s1935_s27   ;;  %s1459_s26 = sphi %s1519_s26, %s1934_s26   ;;  %s1455_s25 = sphi %s1517_s25, %s1933_s25   ;;  %s1451_s24 = sphi %s1515_s24, %s1932_s24  }
   0x4   : > { %s1540_s30 = sadd.s32 1, %s1463_s27   ;;  %s179_s8 = sadd.s32 1, %s1459_s26 }
   0x5   : > { %s176_s9 = ssub.s32 %s1463_s27, %s1540_s30  ;;  %p189_p0 = scmp.ne.s32.totalorder %s1459_s26, %s1455_s25 }
   0x6   : > { %p177_p1 = scmp.eq.s32.totalorder %s176_s9, 0  ;;  %p190_p2 = scmp.eq.s32.totalorder %s1536_s28, 1 }
   0x7   : > { %p195_p3 = scmp.ne.s32.totalorder %s1455_s25, %s1451_s24  ;;  %p196_p4 = scmp.eq.s32.totalorder %s1181_s29, 1 }
   0x8   : > { %s1551_s10 = scalar_select %p177_p1, %s1459_s26, %s179_s8  }
   0x9   : > { %p1553_p5 = por %p190_p2, %p189_p0  ;;  %p1557_p6 = por %p196_p4, %p195_p3 }
   0xa   : > { %p1184_p7 = scmp.ge.s32.totalorder %s1463_s27, 1  ;;  %p240_p8 = scmp.lt.s32.totalorder %s1463_s27, 3 }
   0xc   : > { %p241_p9 = pnand %p1184_p7, %p240_p8 }
   0xd   : > { %v1365_v0 = vld [vmem:[%s1919_s1 + $0x40] sm:$0xff] (!%p241_p9)   ;;  %p272_p10 = scmp.lt.s32.totalorder (!%p241_p9), %s1536_s28, 1  ;;  %v1367_v2 = vld [vmem:[%s1919_s1 + $0x48] sm:$0xff] (!%p241_p9)   ;;  %v1369_v4 = vld [vmem:[%s1919_s1 + $0x50] sm:$0xff] (!%p241_p9)   ;;  %vm1927_vm0 = vcmask (!%p241_p9), 123904   ;;  %vm607_vm1 = vcmask (!%p241_p9), 125954  }
   0xe   : > { %244 = sbr.rel (%p241_p9) target bundleno = 1086 (0x43e), region = 48  ;;  %v1366_v1 = vld [vmem:[%s1919_s1] sm:$0xff] (!%p241_p9)   ;;  %1231 = vmatprep.subr.bf16.mxu0 (!%p241_p9), %v1365_v0  ;;  %v1368_v3 = vld [vmem:[%s1919_s1 + $0x8] sm:$0xff] (!%p241_p9)   ;;  %v1370_v5 = vld [vmem:[%s1919_s1 + $0x10] sm:$0xff] (!%p241_p9)   ;;  %vm757_vm2 = vcmask (!%p241_p9), 130054   ;;  %vm679_vm3 = vcmask (!%p241_p9), 128004  }
   0xf   : > { %1232 = vmatpush3.bf16.msra.mxu0 (!%p241_p9), %v1366_v1  ;;  %v1371_v6 = vld [vmem:[%s1919_s1 + $0x58] sm:$0xff] (!%p241_p9)   ;;  %v1373_v8 = vld [vmem:[%s1919_s1 + $0x60] sm:$0xff] (!%p241_p9)   ;;  %v1375_v10 = vld [vmem:[%s1919_s1 + $0x68] sm:$0xff] (!%p241_p9)   ;;  %s1466_s8 = smov (!%p241_p9), 112   ;;  %s1467_s9 = smov (!%p241_p9), 32   ;;  %vm529_vm4 = vcmask (!%p241_p9), 255104  }
  0x10   : > { %1233 = vmatprep.subr.bf16.mxu0 (!%p241_p9), %v1367_v2  ;;  %v1372_v7 = vld [vmem:[%s1919_s1 + $0x18] sm:$0xff] (!%p241_p9)   ;;  %v1374_v9 = vld [vmem:[%s1919_s1 + $0x20] sm:$0xff] (!%p241_p9)   ;;  %v1376_v14 = vld [vmem:[%s1919_s1 + $0x28] sm:$0xff] (!%p241_p9)   ;;  %s1468_s13 = smov (!%p241_p9), 48   ;;  %s1470_s15 = smov (!%p241_p9), 80   ;;  %vm612_vm5 = vcmask (!%p241_p9), 257154  }
  0x11   : > { %v1377_v15 = vld [vmem:[%s1919_s1 + $0x70] sm:$0xff] (!%p241_p9)   ;;  %v1379_v17 = vld [vmem:[%s1919_s1 + $0x78] sm:$0xff] (!%p241_p9)   ;;  %v1639_v45 = vld [vmem:[%s1920_s2] ss:$0 sm:$0xff] (!%p241_p9)  ;;  %s1471_s16 = smov (!%p241_p9), 96   ;;  %vm535_vm6 = vcmask (!%p241_p9), 386304  }
  0x12   : > { %v1378_v16 = vld [vmem:[%s1919_s1 + $0x30] sm:$0xff] (!%p241_p9)   ;;  %v1380_v18 = vld [vmem:[%s1919_s1 + $0x38] sm:$0xff] (!%p241_p9)   ;;  %vm541_vm7 = vcmask (!%p241_p9), 517504   ;;  %vm617_vm8 = vcmask (!%p241_p9), 388354   ;;  %vm622_vm9 = vcmask (!%p241_p9), 519554   ;;  %vm548_vm10 = vcmask (!%p241_p9), 648704  }
  0x13   : > { %1234 = vmatpush3.bf16.msra.mxu0 (!%p241_p9), %v1368_v3  ;;  %vm554_vm11 = vcmask (!%p241_p9), 779904   ;;  %vm560_vm12 = vcmask (!%p241_p9), 911104   ;;  %vm762_vm13 = vcmask (!%p241_p9), 261254   ;;  %vm628_vm14 = vcmask (!%p241_p9), 650754   ;;  %s269_s22 = sand.u32 (!%p241_p9), 1, %s1455_s25   ;;  %s1474_s20 = smov (!%p241_p9), [#allocation4]  }
  0x14   : > { %1235 = vmatprep.subr.bf16.mxu0 (!%p241_p9), %v1369_v4  ;;  %vm633_vm15 = vcmask (!%p241_p9), 781954  }
  0x15   : > { %s273_s23 = scalar_select %p272_p10, %s1536_s28, 1 }
  0x17   : > { %s1316_s14 = smul.u32 144, %s273_s23  ;;  %1236 = vmatpush3.bf16.msra.mxu0 %v1370_v5 }
  0x18   : > { %1237 = vmatprep.subr.bf16.mxu0 %v1371_v6 }
  0x19   : > { %s1595_s21 = scalar_lea.vmem %s1918_s0, %s1316_s14  ;;  %s1469_s14 = smov 64  }
  0x1a   : > { %v279_v11 = vld [vmem:[%s1595_s21 + $0x8] sm:$0xff]  ;;  %v281_v12 = vld [vmem:[%s1595_s21 + $0x18] sm:$0xff]  ;;  %v278_v19 = vld [vmem:[%s1595_s21] sm:$0xff] }
  0x1b   : > { %1238 = vmatpush3.bf16.msra.mxu0 %v1372_v7  ;;  %v297_v13 = vpack.c.bf16 %v281_v12, %v279_v11  ;;  %v280_v20 = vld [vmem:[%s1595_s21 + $0x10] sm:$0xff]  ;;  %v283_v21 = vld [vmem:[%s1595_s21 + $0x28] sm:$0xff]  ;;  %v285_v22 = vld [vmem:[%s1595_s21 + $0x38] sm:$0xff] }
  0x1c   : > { %1239 = vmatprep.subr.bf16.mxu0 %v1373_v8  ;;  %v296_v23 = vpack.c.bf16 %v280_v20, %v278_v19  ;;  %v299_v24 = vpack.c.bf16 %v285_v22, %v283_v21  ;;  %v282_v25 = vld [vmem:[%s1595_s21 + $0x20] sm:$0xff]  ;;  %v284_v26 = vld [vmem:[%s1595_s21 + $0x30] sm:$0xff]  ;;  %v287_v27 = vld [vmem:[%s1595_s21 + $0x48] sm:$0xff] }
  0x1d   : > { %473 = vmatprep.mubr.bf16.mxu0 %v297_v13  ;;  %v289_v28 = vld [vmem:[%s1595_s21 + $0x58] sm:$0xff]  ;;  %v298_v29 = vpack.c.bf16 %v284_v26, %v282_v25  ;;  %v286_v31 = vld [vmem:[%s1595_s21 + $0x40] sm:$0xff]  ;;  %v288_v32 = vld [vmem:[%s1595_s21 + $0x50] sm:$0xff] }
  0x1e   : > { %v301_v30 = vpack.c.bf16 %v289_v28, %v287_v27  ;;  %v291_v33 = vld [vmem:[%s1595_s21 + $0x68] sm:$0xff]  ;;  %v293_v34 = vld [vmem:[%s1595_s21 + $0x78] sm:$0xff]  ;;  %v300_v35 = vpack.c.bf16 %v288_v32, %v286_v31  ;;  %v290_v37 = vld [vmem:[%s1595_s21 + $0x60] sm:$0xff] }
  0x1f   : > { %1240 = vmatpush3.bf16.msra.mxu0 %v1374_v9  ;;  %v303_v36 = vpack.c.bf16 %v293_v34, %v291_v33  ;;  %v292_v38 = vld [vmem:[%s1595_s21 + $0x70] sm:$0xff]  ;;  %v295_v39 = vld [vmem:[%s1595_s21 + $0x88] sm:$0xff]  ;;  %v294_v42 = vld [vmem:[%s1595_s21 + $0x80] sm:$0xff]  ;;  %s1926_s21 = smov 16  }
  0x20   : > { %1241 = vmatprep.subr.bf16.mxu0 %v1375_v10  ;;  %v302_v40 = vpack.c.bf16 %v292_v38, %v290_v37  ;;  %v305_v41 = vpack.c.bf16 %v295_v39, %v295_v39  ;;  %v304_v43 = vpack.c.bf16 %v294_v42, %v294_v42 }
  0x23   : > { %1242 = vmatpush3.bf16.msra.mxu0 %v1376_v14 }
  0x24   : > { %1243 = vmatprep.subr.bf16.mxu0 %v1377_v15 }
  0x27   : > { %1244 = vmatpush3.bf16.msra.mxu0 %v1378_v16 }
  0x28   : > { %1245 = vmatprep.subr.bf16.mxu0 %v1379_v17 }
  0x2b   : > { %1246 = vmatpush3.bf16.msra.mxu0 %v1380_v18 }
  0x2e   : > { %474 = vmatmul.mubr.bf16.vlgmr.msra.gmra.mrb[0].mxu0 %v296_v23 }
  0x2f   : > { %481 = vmatprep.mubr.bf16.mxu0 %v299_v24 }
  0x36   : > { %482 = vmatmul.mubr.bf16.gmra.mrb[4].mxu0 %v298_v29 }
  0x37   : > { %489 = vmatprep.mubr.bf16.mxu0 %v301_v30 }
  0x3e   : > { %490 = vmatmul.mubr.bf16.gmra.mrb[8].mxu0 %v300_v35 }
  0x3f   : > { %497 = vmatprep.mubr.bf16.mxu0 %v303_v36 }
  0x46   : > { %498 = vmatmul.mubr.bf16.gmra.mrb[12].mxu0 %v302_v40 }
  0x47   : > { %505 = vmatprep.mubr.bf16.mxu0 %v305_v41 }
  0x4e   : > { %506 = vmatmul.mubr.bf16.gmra.mrb[16].mxu0 %v304_v43 }
 0x101   : > { %v1247_v44 = vpop.f32.mrb[0].mxu0 }
 0x102   : > { %v1248_v46 = vpop.f32.mrb[1].mxu0 }
 0x103   : > { %v1249_v47 = vadd.f32 %v1248_v46, %v1247_v44  ;;  %v1250_v48 = vpop.f32.mrb[2].mxu0 }
 0x104   : > { %v1251_v49 = vpop.f32.mrb[3].mxu0 }
 0x105   : > { %v476_v50 = vadd.f32 %v1249_v47, %v1639_v45  ;;  %v1252_v51 = vadd.f32 %v1251_v49, %v1250_v48  ;;  %v1381_v48 = vld [vmem:[%s1921_s3 + $0x40] sm:$0xff]  }
 0x106   : > { %v1382_v49 = vld [vmem:[%s1921_s3] sm:$0xff]   ;;  %1277 = vmatprep.subr.bf16.mxu1 %v1381_v48 }
 0x107   : > { %v513_v52 = vmax.f32 %v476_v50, 0.0  ;;  %v479_v10 = vadd.f32 %v1252_v51, %v1639_v45  ;;  %1278 = vmatpush3.bf16.msra.mxu1 %v1382_v49  ;;  %v1383_v51 = vld [vmem:[%s1921_s3 + $0x48] sm:$0xff]  }
 0x108   : > { %1279 = vmatprep.subr.bf16.mxu1 %v1383_v51 }
 0x109   : > { %v1253_v53 = vpop.f32.mrb[4].mxu0  ;;  %v525_v54 = vrot.slane %v513_v52, 2  ;;  %523 = vst.msk [vmem:[#allocation2] sm:$0x3] %vm1927_vm0, %v513_v52  ;;  %v531_v61 = vrot.slane %v513_v52, 4  ;;  %v537_v12 = vrot.slane %v513_v52, 6 }
 0x10a   : > { %v1254_v55 = vpop.f32.mrb[5].mxu0  ;;  %v514_v14 = vmax.f32 %v479_v10, 0.0  ;;  %v1384_v52 = vld [vmem:[%s1921_s3 + $0x8] sm:$0xff]  }
 0x10b   : > { %v1255_v56 = vadd.f32 %v1254_v55, %v1253_v53  ;;  %v1256_v57 = vpop.f32.mrb[6].mxu0  ;;  %526 = vrot.lane.b32.xlu0 %v525_v54, %s1926_s21  ;;  %608 = vst.msk [vmem:[#allocation2] sm:$0xc] %vm607_vm1, %v525_v54  ;;  %1280 = vmatpush3.bf16.msra.mxu1 %v1384_v52  ;;  %v1385_v53 = vld [vmem:[%s1921_s3 + $0x50] sm:$0xff]  }
 0x10c   : > { %v1257_v58 = vpop.f32.mrb[7].mxu0  ;;  %v550_v21 = vrot.slane %v514_v14, 6  ;;  %v544_v27 = vrot.slane %v514_v14, 4  ;;  %v1386_v54 = vld [vmem:[%s1921_s3 + $0x10] sm:$0xff]   ;;  %1281 = vmatprep.subr.bf16.mxu1 %v1385_v53 }
 0x10d   : > { %v484_v59 = vadd.f32 %v1255_v56, %v1639_v45  ;;  %v1258_v60 = vadd.f32 %v1257_v58, %v1256_v57  ;;  %v1387_v56 = vld [vmem:[%s1921_s3 + $0x58] sm:$0xff]  }
 0x10e   : > { %v1388_v57 = vld [vmem:[%s1921_s3 + $0x18] sm:$0xff]  }
 0x10f   : > { %v1646_v62 = vmax.f32 %v484_v59, 0.0  ;;  %v487_v63 = vadd.f32 %v1258_v60, %v1639_v45  ;;  %609 = vrot.lane.b32.xlu0 %v531_v61, %s1926_s21  ;;  %1282 = vmatpush3.bf16.msra.mxu1 %v1386_v54  ;;  %v1389_v59 = vld [vmem:[%s1921_s3 + $0x60] sm:$0xff]  }
 0x110   : > { %1283 = vmatprep.subr.bf16.mxu1 %v1387_v56  ;;  %v1390_v60 = vld [vmem:[%s1921_s3 + $0x20] sm:$0xff]  }
 0x111   : > { %v1650_v0 = vmax.f32 %v487_v63, 0.0  ;;  %v640_v1 = vrot.slane %v1646_v62, 4  ;;  %v1259_v2 = vpop.f32.mrb[8].mxu0  ;;  %v624_v41 = vrot.slane %v1646_v62, 6  ;;  %v562_v42 = vrot.slane %v1646_v62, 2  ;;  %v1392_v63 = vld [vmem:[%s1921_s3 + $0x28] sm:$0xff]  }
 0x112   : > { %v1260_v3 = vpop.f32.mrb[9].mxu0 }
 0x113   : > { %641 = vrot.lane.b32.xlu1 %v640_v1, %s1466_s8  ;;  %532 = vrot.lane.b32.xlu0 %v531_v61, %s1467_s9  ;;  %v1261_v4 = vadd.f32 %v1260_v3, %v1259_v2  ;;  %v1262_v5 = vpop.f32.mrb[10].mxu0  ;;  %v1656_v6 = vrot.slane %v1650_v0, 4  ;;  %v1659_v7 = vrot.slane %v1650_v0, 6  ;;  %v1662_v8 = vrot.slane %v1650_v0, 2  ;;  %568 = vst.msk [vmem:[#allocation2 + $0x8] sm:$0x3] %vm1927_vm0, %v1650_v0 }
 0x114   : > { %v1263_v9 = vpop.f32.mrb[11].mxu0  ;;  %1284 = vmatpush3.bf16.msra.mxu1 %v1388_v57  ;;  %v1394_v1 = vld [vmem:[%s1921_s3 + $0x30] sm:$0xff]   ;;  %v1395_v2 = vld [vmem:[%s1921_s3 + $0x78] sm:$0xff]   ;;  %vm684_vm0 = vcmask 259204  }
 0x115   : > { %v1264_v11 = vadd.f32 %v1263_v9, %v1262_v5  ;;  %647 = vst.msk [vmem:[#allocation2 + $0x8] sm:$0xc] %vm607_vm1, %v1662_v8  ;;  %v492_v13 = vadd.f32 %v1261_v4, %v1639_v45  ;;  %1285 = vmatprep.subr.bf16.mxu1 %v1389_v59  ;;  %v1396_v4 = vld [vmem:[%s1921_s3 + $0x38] sm:$0xff]   ;;  %vm638_vm1 = vcmask 913154  }
 0x116   : > { %758 = vst.msk [vmem:[#allocation2] sm:$0xc0] %vm757_vm2, %v1659_v7 }
 0x117   : > { %680 = vst.msk [vmem:[#allocation2] sm:$0x30] %vm679_vm3, %v1656_v6  ;;  %576 = vrot.lane.b32.xlu1 %v1656_v6, %s1467_s9  ;;  %538 = vrot.lane.b32.xlu0 %v537_v12, %s1468_s13  ;;  %v1677_v17 = vmax.f32 %v492_v13, 0.0  ;;  %v495_v37 = vadd.f32 %v1264_v11, %v1639_v45 }
 0x118   : > { %1286 = vmatpush3.bf16.msra.mxu1 %v1390_v60 }
 0x119   : > { %v1265_v15 = vpop.f32.mrb[12].mxu0  ;;  %v591_v26 = vrot.slane %v1677_v17, 6  ;;  %v586_v35 = vrot.slane %v1677_v17, 4  ;;  %v1700_v38 = vmax.f32 %v495_v37, 0.0  ;;  %v701_v47 = vrot.slane %v1677_v17, 2 }
 0x11a   : > { %v1266_v16 = vpop.f32.mrb[13].mxu0 }
 0x11b   : > { %581 = vrot.lane.b32.xlu1 %v1659_v7, %s1468_s13  ;;  %619 = vrot.lane.b32.xlu0 %v514_v14, %s1468_s13  ;;  %v1267_v18 = vadd.f32 %v1266_v16, %v1265_v15  ;;  %v1268_v19 = vpop.f32.mrb[14].mxu0  ;;  %v1711_v39 = vrot.slane %v1700_v38, 6  ;;  %v601_v40 = vrot.slane %v1700_v38, 2  ;;  %v673_v43 = vrot.slane %v1700_v38, 4 }
 0x11c   : > { %v1269_v20 = vpop.f32.mrb[15].mxu0 }
 0x11d   : > { %v500_v22 = vadd.f32 %v1267_v18, %v1639_v45  ;;  %v1270_v23 = vadd.f32 %v1269_v20, %v1268_v19 }
 0x11f   : > { %656 = vrot.lane.b32.xlu1 %v1677_v17, %s1468_s13  ;;  %614 = vrot.lane.b32.xlu0 %v550_v21, %s1467_s9  ;;  %v519_v24 = vmax.f32 %v500_v22, 0.0  ;;  %v503_v25 = vadd.f32 %v1270_v23, %v1639_v45 }
 0x121   : > { %v721_v28 = vrot.slane %v519_v24, 6  ;;  %v1271_v29 = vpop.f32.mrb[16].mxu0  ;;  %v718_v31 = vrot.slane %v519_v24, 4  ;;  %v730_v44 = vrot.slane %v519_v24, 2 }
 0x122   : > { %v1272_v30 = vpop.f32.mrb[17].mxu0 }
 0x123   : > { %652 = vrot.lane.b32.xlu1 %v591_v26, %s1467_s9  ;;  %545 = vrot.lane.b32.xlu0 %v544_v27, %s1469_s14  ;;  %v1273_v32 = vadd.f32 %v1272_v30, %v1271_v29  ;;  %v1274_v33 = vpop.f32.mrb[18].mxu0  ;;  %795 = vst.msk [vmem:[#allocation2 + $0x8] sm:$0xc0] %vm757_vm2, %v721_v28  ;;  %vm644_vm2 = vcmask 1044354  }
 0x124   : > { %v1275_v34 = vpop.f32.mrb[19].mxu0  ;;  %720 = vst.msk [vmem:[#allocation2 + $0x8] sm:$0x30] %vm679_vm3, %v718_v31  ;;  %vm566_vm3 = vcmask 1042304  }
 0x125   : > { %v508_v36 = vadd.f32 %v1273_v32, %v1639_v45  ;;  %v520_v45 = vmax.f32 %v503_v25, 0.0 }
 0x127   : > { %587 = vrot.lane.b32.xlu1 %v586_v35, %s1469_s14  ;;  %551 = vrot.lane.b32.xlu0 %v550_v21, %s1470_s15  ;;  %v740_v46 = vrot.slane %v520_v45, 2  ;;  %v804_v50 = vrot.slane %v520_v45, 4  ;;  %v521_v55 = vmax.f32 %v508_v36, 0.0 }
 0x129   : > { %v809_v58 = vrot.slane %v521_v55, 2  ;;  %v746_v61 = vrot.slane %v521_v55, 4  ;;  %v751_v3 = vrot.slane %v521_v55, 6 }
 0x12b   : > { %592 = vrot.lane.b32.xlu1 %v591_v26, %s1470_s15  ;;  %630 = vrot.lane.b32.xlu0 %v1646_v62, %s1470_s15 }
 0x12f   : > { %665 = vrot.lane.b32.xlu1 %v1700_v38, %s1470_s15  ;;  %557 = vrot.lane.b32.xlu0 %v1646_v62, %s1471_s16  ;;  %v1391_v62 = vld [vmem:[%s1921_s3 + $0x68] sm:$0xff]  }
 0x130   : > { %1287 = vmatprep.subr.bf16.mxu1 %v1391_v62 }
 0x131   : > { %1288 = vmatpush3.bf16.msra.mxu1 %v1392_v63 }
 0x133   : > { %597 = vrot.lane.b32.xlu1 %v1700_v38, %s1471_s16  ;;  %759 = vrot.lane.b32.xlu0 %v1650_v0, %s1926_s21 }
 0x137   : > { %661 = vrot.lane.b32.xlu1 %v1711_v39, %s1469_s14  ;;  %686 = vrot.lane.b32.xlu0 %v1650_v0, %s1467_s9  ;;  %v1393_v0 = vld [vmem:[%s1921_s3 + $0x70] sm:$0xff]  }
 0x138   : > { %1289 = vmatprep.subr.bf16.mxu1 %v1393_v0 }
 0x139   : > { %1290 = vmatpush3.bf16.msra.mxu1 %v1394_v1  ;;  %v1397_v1 = vld [vmem:[%s1923_s5] sm:$0xff]  }
 0x13a   : > { %1291 = vmatprep.subr.bf16.mxu1 %v1395_v2  ;;  %v1472_v2 = vmov 0.0  }
 0x13b   : > { %669 = vrot.lane.b32.xlu1 %v601_v40, %s1471_s16  ;;  %625 = vrot.lane.b32.xlu0 %v624_v41, %s1469_s14 }
 0x13d   : > { %1292 = vmatpush3.bf16.msra.mxu1 %v1396_v4  ;;  %v1399_v4 = vld [vmem:[%s1923_s5 + $0x10] sm:$0xff]  }
 0x13e   : > { %1304 = vmatprep.subr.bf16.mxu1 %v1472_v2 }
 0x13f   : > { %602 = vrot.lane.b32.xlu1 %v601_v40, %s1466_s8  ;;  %635 = vrot.lane.b32.xlu0 %v562_v42, %s1471_s16 }
 0x143   : > { %674 = vrot.lane.b32.xlu1 %v673_v43, %s1466_s8  ;;  %563 = vrot.lane.b32.xlu0 %v562_v42, %s1466_s8 }
 0x147   : > { %796 = vrot.lane.b32.xlu1 %v519_v24, %s1926_s21  ;;  %571 = vrot.lane.b32.xlu0 %v1662_v8, %s1926_s21 }
 0x14b   : > { %726 = vrot.lane.b32.xlu1 %v519_v24, %s1467_s9  ;;  %648 = vrot.lane.b32.xlu0 %v1656_v6, %s1926_s21 }
 0x14f   : > { %722 = vrot.lane.b32.xlu1 %v721_v28, %s1926_s21  ;;  %681 = vrot.lane.b32.xlu0 %v1659_v7, %s1926_s21  ;;  %s1405_s21 = sshll.u32 %s1474_s20, 4  ;;  %s1406_s21 = int_to_ptr.vmem [resolvable:$false] %s1405_s21 }
 0x153   : > { %731 = vrot.lane.b32.xlu1 %v730_v44, %s1468_s13  ;;  %691 = vrot.lane.b32.xlu0 %v1662_v8, %s1468_s13 }
 0x157   : > { %736 = vrot.lane.b32.xlu1 %v520_v45, %s1469_s14  ;;  %696 = vrot.lane.b32.xlu0 %v1677_v17, %s1469_s14 }
 0x15b   : > { %800 = vrot.lane.b32.xlu1 %v740_v46, %s1467_s9  ;;  %764 = vrot.lane.b32.xlu0 %v701_v47, %s1467_s9 }
 0x15f   : > { %805 = vrot.lane.b32.xlu1 %v804_v50, %s1468_s13  ;;  %769 = vrot.lane.b32.xlu0 %v586_v35, %s1468_s13 }
 0x163   : > { %741 = vrot.lane.b32.xlu1 %v740_v46, %s1470_s15  ;;  %702 = vrot.lane.b32.xlu0 %v701_v47, %s1470_s15 }
 0x167   : > { %822 = vrot.lane.b32.xlu1 %v521_v55, %s1466_s8  ;;  %774 = vrot.lane.b32.xlu0 %v601_v40, %s1469_s14 }
 0x16b   : > { %810 = vrot.lane.b32.xlu1 %v809_v58, %s1469_s14  ;;  %779 = vrot.lane.b32.xlu0 %v673_v43, %s1470_s15 }
 0x16f   : > { %814 = vrot.lane.b32.xlu1 %v746_v61, %s1470_s15  ;;  %707 = vrot.lane.b32.xlu0 %v673_v43, %s1471_s16  ;;  %s1931_s15 = smov 16  }
 0x173   : > { %747 = vrot.lane.b32.xlu1 %v746_v61, %s1471_s16  ;;  %784 = vrot.lane.b32.xlu0 %v1711_v39, %s1471_s16 }
 0x177   : > { %818 = vrot.lane.b32.xlu1 %v751_v3, %s1471_s16  ;;  %712 = vrot.lane.b32.xlu0 %v1711_v39, %s1466_s8 }
 0x17b   : > { %752 = vrot.lane.b32.xlu1 %v751_v3, %s1466_s8  ;;  %v1398_v3 = vld [vmem:[%s1923_s5 + $0x8] sm:$0xff]  }
 0x17d   : > { %v527_v5 = vpop.permute.xlu0 %526 }
 0x17e   : > { %530 = vst.msk [vmem:[#allocation2] sm:$0x3] %vm529_vm4, %v527_v5 }
 0x17f   : > { %789 = vrot.lane.b32.xlu1 %v1700_v38, %s1466_s8 }
 0x181   : > { %v610_v6 = vpop.permute.xlu0 %609 }
 0x182   : > { %613 = vst.msk [vmem:[#allocation2] sm:$0xc] %vm612_vm5, %v610_v6  ;;  %v1204_v6 = vld [vmem:[%s1922_s4] ss:$0 sm:$0xff] }
 0x185   : > { %v642_v7 = vpop.permute.xlu1 %641  ;;  %v533_v8 = vpop.permute.xlu0 %532 }
 0x186   : > { %536 = vst.msk [vmem:[#allocation2] sm:$0x3] %vm535_vm6, %v533_v8 }
 0x189   : > { %v577_v9 = vpop.permute.xlu1 %576  ;;  %v539_v10 = vpop.permute.xlu0 %538 }
 0x18a   : > { %542 = vst.msk [vmem:[#allocation2] sm:$0x3] %vm541_vm7, %v539_v10  ;;  %v1400_v10 = vld [vmem:[%s1923_s5 + $0x18] sm:$0xff]  }
 0x18d   : > { %v582_v11 = vpop.permute.xlu1 %581  ;;  %v620_v12 = vpop.permute.xlu0 %619 }
 0x191   : > { %v657_v13 = vpop.permute.xlu1 %656  ;;  %v615_v14 = vpop.permute.xlu0 %614 }
 0x192   : > { %618 = vst.msk [vmem:[#allocation2] sm:$0xc] %vm617_vm8, %v615_v14 }
 0x193   : > { %623 = vst.msk [vmem:[#allocation2] sm:$0xc] %vm622_vm9, %v620_v12 }
 0x195   : > { %v653_v15 = vpop.permute.xlu1 %652  ;;  %v546_v16 = vpop.permute.xlu0 %545 }
 0x196   : > { %549 = vst.msk [vmem:[#allocation2] sm:$0x3] %vm548_vm10, %v546_v16 }
 0x199   : > { %v588_v17 = vpop.permute.xlu1 %587  ;;  %v552_v18 = vpop.permute.xlu0 %551 }
 0x19a   : > { %555 = vst.msk [vmem:[#allocation2] sm:$0x3] %vm554_vm11, %v552_v18 }
 0x19d   : > { %v593_v19 = vpop.permute.xlu1 %592  ;;  %v631_v20 = vpop.permute.xlu0 %630 }
 0x1a1   : > { %v666_v21 = vpop.permute.xlu1 %665  ;;  %v558_v22 = vpop.permute.xlu0 %557 }
 0x1a2   : > { %561 = vst.msk [vmem:[#allocation2] sm:$0x3] %vm560_vm12, %v558_v22 }
 0x1a5   : > { %v598_v23 = vpop.permute.xlu1 %597  ;;  %v760_v24 = vpop.permute.xlu0 %759 }
 0x1a6   : > { %763 = vst.msk [vmem:[#allocation2] sm:$0xc0] %vm762_vm13, %v760_v24 }
 0x1a9   : > { %v662_v25 = vpop.permute.xlu1 %661  ;;  %v687_v26 = vpop.permute.xlu0 %686 }
 0x1ad   : > { %v670_v27 = vpop.permute.xlu1 %669  ;;  %v626_v28 = vpop.permute.xlu0 %625 }
 0x1ae   : > { %629 = vst.msk [vmem:[#allocation2] sm:$0xc] %vm628_vm14, %v626_v28 }
 0x1af   : > { %634 = vst.msk [vmem:[#allocation2] sm:$0xc] %vm633_vm15, %v631_v20 }
 0x1b1   : > { %v603_v29 = vpop.permute.xlu1 %602  ;;  %v636_v30 = vpop.permute.xlu0 %635 }
 0x1b2   : > { %639 = vst.msk [vmem:[#allocation2] sm:$0xc] %vm638_vm1, %v636_v30 }
 0x1b3   : > { %645 = vst.msk [vmem:[#allocation2] sm:$0xc] %vm644_vm2, %v642_v7 }
 0x1b5   : > { %v675_v31 = vpop.permute.xlu1 %674  ;;  %v564_v32 = vpop.permute.xlu0 %563 }
 0x1b6   : > { %567 = vst.msk [vmem:[#allocation2] sm:$0x3] %vm566_vm3, %v564_v32 }
 0x1b9   : > { %v797_v33 = vpop.permute.xlu1 %796  ;;  %v572_v34 = vpop.permute.xlu0 %571 }
 0x1ba   : > { %799 = vst.msk [vmem:[#allocation2 + $0x8] sm:$0xc0] %vm762_vm13, %v797_v33  ;;  %vm787_vm13 = vcmask 917254  }
 0x1bb   : > { %574 = vst.msk [vmem:[#allocation2 + $0x8] sm:$0x3] %vm529_vm4, %v572_v34  ;;  %vm689_vm4 = vcmask 390404  }
 0x1bc   : > { %579 = vst.msk [vmem:[#allocation2 + $0x8] sm:$0x3] %vm535_vm6, %v577_v9  ;;  %vm694_vm6 = vcmask 521604  }
 0x1bd   : > { %584 = vst.msk [vmem:[#allocation2 + $0x8] sm:$0x3] %vm541_vm7, %v582_v11  ;;  %v727_v35 = vpop.permute.xlu1 %726  ;;  %v649_v36 = vpop.permute.xlu0 %648  ;;  %vm699_vm7 = vcmask 652804  }
 0x1be   : > { %590 = vst.msk [vmem:[#allocation2 + $0x8] sm:$0x3] %vm548_vm10, %v588_v17  ;;  %vm777_vm10 = vcmask 654854  }
 0x1bf   : > { %595 = vst.msk [vmem:[#allocation2 + $0x8] sm:$0x3] %vm554_vm11, %v593_v19  ;;  %vm782_vm11 = vcmask 786054   ;;  %v1221_v19 = vld [vmem:[%s1924_s6] ss:$0 sm:$0xff] }
 0x1c0   : > { %651 = vst.msk [vmem:[#allocation2 + $0x8] sm:$0xc] %vm612_vm5, %v649_v36 }
 0x1c1   : > { %600 = vst.msk [vmem:[#allocation2 + $0x8] sm:$0x3] %vm560_vm12, %v598_v23  ;;  %v723_v37 = vpop.permute.xlu1 %722  ;;  %v682_v38 = vpop.permute.xlu0 %681  ;;  %vm710_vm12 = vcmask 915204  }
 0x1c2   : > { %655 = vst.msk [vmem:[#allocation2 + $0x8] sm:$0xc] %vm617_vm8, %v653_v15  ;;  %vm767_vm8 = vcmask 392454  }
 0x1c3   : > { %605 = vst.msk [vmem:[#allocation2 + $0x8] sm:$0x3] %vm566_vm3, %v603_v29  ;;  %vm1061_vm3 = vcmask 523264  }
 0x1c4   : > { %659 = vst.msk [vmem:[#allocation2 + $0x8] sm:$0xc] %vm622_vm9, %v657_v13  ;;  %vm705_vm9 = vcmask 784004  }
 0x1c5   : > { %664 = vst.msk [vmem:[#allocation2 + $0x8] sm:$0xc] %vm628_vm14, %v662_v25  ;;  %v732_v39 = vpop.permute.xlu1 %731  ;;  %v692_v40 = vpop.permute.xlu0 %691  ;;  %vm715_vm14 = vcmask 1046404  }
 0x1c6   : > { %668 = vst.msk [vmem:[#allocation2 + $0x8] sm:$0xc] %vm633_vm15, %v666_v21  ;;  %vm792_vm15 = vcmask 1048454  }
 0x1c7   : > { %725 = vst.msk [vmem:[#allocation2 + $0x8] sm:$0x30] %vm684_vm0, %v723_v37  ;;  %685 = vst.msk [vmem:[#allocation2] sm:$0x30] %vm684_vm0, %v682_v38  ;;  %vm772_vm0 = vcmask 523654  }
 0x1c8   : > { %672 = vst.msk [vmem:[#allocation2 + $0x8] sm:$0xc] %vm638_vm1, %v670_v27  ;;  %vm1473_vm1 = vmmov 0  }
 0x1c9   : > { %729 = vst.msk [vmem:[#allocation2 + $0x8] sm:$0x30] %vm689_vm4, %v727_v35  ;;  %690 = vst.msk [vmem:[#allocation2] sm:$0x30] %vm689_vm4, %v687_v26  ;;  %v737_v41 = vpop.permute.xlu1 %736  ;;  %v697_v42 = vpop.permute.xlu0 %696 }
 0x1ca   : > { %677 = vst.msk [vmem:[#allocation2 + $0x8] sm:$0xc] %vm644_vm2, %v675_v31  ;;  %vm1930_vm2 = vcmask 123904  }
 0x1cb   : > { %734 = vst.msk [vmem:[#allocation2 + $0x8] sm:$0x30] %vm694_vm6, %v732_v39  ;;  %695 = vst.msk [vmem:[#allocation2] sm:$0x30] %vm694_vm6, %v692_v40 }
 0x1cc   : > { %739 = vst.msk [vmem:[#allocation2 + $0x8] sm:$0x30] %vm699_vm7, %v737_v41  ;;  %700 = vst.msk [vmem:[#allocation2] sm:$0x30] %vm699_vm7, %v697_v42 }
 0x1cd   : > { %v801_v43 = vpop.permute.xlu1 %800  ;;  %v765_v44 = vpop.permute.xlu0 %764 }
 0x1ce   : > { %803 = vst.msk [vmem:[#allocation2 + $0x8] sm:$0xc0] %vm767_vm8, %v801_v43  ;;  %768 = vst.msk [vmem:[#allocation2] sm:$0xc0] %vm767_vm8, %v765_v44 }
 0x1d1   : > { %v806_v45 = vpop.permute.xlu1 %805  ;;  %v770_v46 = vpop.permute.xlu0 %769 }
 0x1d2   : > { %808 = vst.msk [vmem:[#allocation2 + $0x8] sm:$0xc0] %vm772_vm0, %v806_v45  ;;  %773 = vst.msk [vmem:[#allocation2] sm:$0xc0] %vm772_vm0, %v770_v46 }
 0x1d5   : > { %v742_v47 = vpop.permute.xlu1 %741  ;;  %v703_v48 = vpop.permute.xlu0 %702 }
 0x1d6   : > { %744 = vst.msk [vmem:[#allocation2 + $0x8] sm:$0x30] %vm705_vm9, %v742_v47  ;;  %706 = vst.msk [vmem:[#allocation2] sm:$0x30] %vm705_vm9, %v703_v48 }
 0x1d9   : > { %v823_v49 = vpop.permute.xlu1 %822  ;;  %v775_v50 = vpop.permute.xlu0 %774 }
 0x1da   : > { %778 = vst.msk [vmem:[#allocation2] sm:$0xc0] %vm777_vm10, %v775_v50 }
 0x1dd   : > { %v811_v51 = vpop.permute.xlu1 %810  ;;  %v780_v52 = vpop.permute.xlu0 %779 }
 0x1de   : > { %813 = vst.msk [vmem:[#allocation2 + $0x8] sm:$0xc0] %vm777_vm10, %v811_v51 }
 0x1df   : > { %783 = vst.msk [vmem:[#allocation2] sm:$0xc0] %vm782_vm11, %v780_v52 }
 0x1e1   : > { %v815_v53 = vpop.permute.xlu1 %814  ;;  %v708_v54 = vpop.permute.xlu0 %707 }
 0x1e2   : > { %817 = vst.msk [vmem:[#allocation2 + $0x8] sm:$0xc0] %vm782_vm11, %v815_v53 }
 0x1e3   : > { %711 = vst.msk [vmem:[#allocation2] sm:$0x30] %vm710_vm12, %v708_v54 }
 0x1e5   : > { %v748_v55 = vpop.permute.xlu1 %747  ;;  %v785_v56 = vpop.permute.xlu0 %784 }
 0x1e6   : > { %750 = vst.msk [vmem:[#allocation2 + $0x8] sm:$0x30] %vm710_vm12, %v748_v55 }
 0x1e7   : > { %788 = vst.msk [vmem:[#allocation2] sm:$0xc0] %vm787_vm13, %v785_v56 }
 0x1e9   : > { %v819_v57 = vpop.permute.xlu1 %818  ;;  %v713_v58 = vpop.permute.xlu0 %712 }
 0x1ea   : > { %821 = vst.msk [vmem:[#allocation2 + $0x8] sm:$0xc0] %vm787_vm13, %v819_v57 }
 0x1eb   : > { %716 = vst.msk [vmem:[#allocation2] sm:$0x30] %vm715_vm14, %v713_v58 }
 0x1ec   : > { %825 = vst.msk [vmem:[#allocation2 + $0x8] sm:$0xc0] %vm792_vm15, %v823_v49 }
 0x1ed   : > { %v753_v59 = vpop.permute.xlu1 %752 }
 0x1ee   : > { %755 = vst.msk [vmem:[#allocation2 + $0x8] sm:$0x30] %vm715_vm14, %v753_v59 }
 0x1f1   : > { %v790_v60 = vpop.permute.xlu1 %789 }
 0x1f2   : > { %793 = vst.msk [vmem:[#allocation2] sm:$0xc0] %vm792_vm15, %v790_v60 }
 0x1f5   : > { %v827_v61 = vld [vmem:[#allocation2 + $0x8] sm:$0xff] }
 0x1f6   : > { %v829_v62 = vpack.c.bf16 %v827_v61, %v827_v61 }
 0x1f8   : > { %997 = vmatprep.mubr.bf16.mxu1 %v829_v62 }
 0x1f9   : > { %v826_v63 = vld [vmem:[#allocation2] sm:$0xff] }
 0x1fa   : > { %v828_v0 = vpack.c.bf16 %v826_v63, %v826_v63 }
 0x1fc   : > { %998 = vmatmul.mubr.bf16.vlgmr.msra.gmra.mrb[0].mxu1 %v828_v0 }
 0x1fd   : > { %1305 = vmatpush3.bf16.msra.mxu1 %v1397_v1  ;;  %1312 = vmatprep.mubr.msk.bf16.mxu1 %vm1473_vm1, %v1472_v2 }
 0x1fe   : > { %1306 = vmatprep.subr.bf16.mxu1 %v1472_v2 }
 0x201   : > { %1307 = vmatpush3.bf16.msra.mxu1 %v1398_v3 }
 0x202   : > { %1308 = vmatprep.subr.bf16.mxu1 %v1472_v2 }
 0x205   : > { %1309 = vmatpush3.bf16.msra.mxu1 %v1399_v4 }
 0x206   : > { %1310 = vmatprep.subr.bf16.mxu1 %v1472_v2 }
 0x209   : > { %1311 = vmatpush3.bf16.msra.mxu1 %v1400_v10 }
 0x2cf   : > { %v1293_v5 = vpop.f32.mrb[0].mxu1 }
 0x2d0   : > { %v1294_v7 = vpop.f32.mrb[1].mxu1 }
 0x2d1   : > { %v1295_v8 = vadd.f32 %v1294_v7, %v1293_v5  ;;  %v1296_v9 = vpop.f32.mrb[2].mxu1 }
 0x2d2   : > { %v1297_v11 = vpop.f32.mrb[3].mxu1 }
 0x2d3   : > { %v1000_v12 = vadd.f32 %v1295_v8, %v1204_v6 }
 0x2d5   : > { %v1005_v13 = vmax.f32 %v1000_v12, 0.0 }
 0x2d7   : > { %1006 = vst.msk [vmem:[#allocation3] sm:$0x3] %vm1930_vm2, %v1005_v13  ;;  %1012 = vrot.lane.b32.xlu1 %v1005_v13, %s1467_s9  ;;  %1008 = vrot.lane.b32.xlu0 %v1005_v13, %s1931_s15  ;;  %s1185_s9 = sshll.u32 %s269_s22, 1  ;;  %s1407_s15 = scalar_lea.vmem %s1406_s21, 64 }
 0x2d8   : > { %s271_s23 = scalar_lea.vmem [#allocation4], %s1185_s9 }
 0x2d9   : > { %s1122_s29 = sshll.u32 %s271_s23, 4  ;;  %s1878_s29 = int_to_ptr.vmem [resolvable:$true] %s1122_s29 }
 0x2da   : > { %s1401_s19 = scalar_lea.vmem %s1878_s29, 32  ;;  %p1408_p0 = scmp.lt.s32.totalorder %s1878_s29, %s1406_s21 }
 0x2db   : > { %1016 = vrot.lane.b32.xlu0 %v1005_v13, %s1468_s13  ;;  %s1228_s13 = sshll.u32 %s1536_s28, 5  ;;  %s1109_s28 = scalar_lea.sflag [#allocation5], %s269_s22 }
 0x2dc   : > { %s1876_s18 = scalar_lea.hbm %s1925_s7, %s1228_s13  ;;  %p1402_p11 = scmp.ne.s32.totalorder %s1878_s29, %s1401_s19 }
 0x2dd   : > { %p1409_p1 = scmp.lt.s32.totalorder %s1407_s15, %s1401_s19 }
 0x2de   : > { %p1403_p12 = pnand %p1402_p11, %p1553_p5 }
 0x2df   : > { %p1410_p2 = por %p1409_p1, %p1408_p0 }
 0x2e0   : > { %p1404_p13 = pneg %p1403_p12 }
 0x2e2   : > { %p1411_p3 = pnand %p1410_p2, %p1404_p13 }
 0x349   : > { %v1013_v14 = vpop.permute.xlu1 %1012  ;;  %v1009_v15 = vpop.permute.xlu0 %1008 }
 0x34a   : > { %1011 = vst.msk [vmem:[#allocation3 - $0x2] sm:$0xc] %vm612_vm5, %v1009_v15  ;;  %vm1106_vm5 = vcmask 517120  }
 0x34b   : > { %1015 = vst.msk [vmem:[#allocation3 - $0x4] sm:$0x30] %vm689_vm4, %v1013_v14 }
 0x34d   : > { %v1017_v16 = vpop.permute.xlu0 %1016 }
 0x34e   : > { %1019 = vst.msk [vmem:[#allocation3 - $0x6] sm:$0xc0] %vm772_vm0, %v1017_v16 }
 0x355   : > { %v1020_v17 = vld [vmem:[#allocation3] sm:$0x3] }
 0x356   : > { %v1021_v18 = vpack.c.bf16 %v1020_v17, %v1020_v17 }
 0x358   : > { %1313 = vmatmul.mubr.msk.bf16.vlgmr.msra.gmra.mrb[4].mxu1 %vm1061_vm3, %v1021_v18 }
 0x42b   : > { %v1099_v20 = vpop.f32.mrb[4].mxu1 }
 0x42c   : > { %v1100_v21 = vadd.f32 %v1221_v19, %v1099_v20  ;;  %v1314_v22 = vpop.f32.mrb[5].mxu1 }
 0x42d   : > { %v1102_v23 = vpop.f32.mrb[6].mxu1 }
 0x42e   : > { %v1105_v24 = vmax.f32 %v1100_v21, 0.0  ;;  %v1315_v25 = vpop.f32.mrb[7].mxu1 }
 0x430   : > { %1107 = vst.msk [vmem:[%s271_s23] sm:$0x3] %vm1106_vm5, %v1105_v24 }
 0x431   : > { %1414 = shalt.err (!%p1411_p3)
}
 0x432   : > { %s1415_s22 = scalar_lea.hbm %s1876_s18, 32  ;;  %s1419_s16 = scalar_lea.hbm %s1925_s7, 64 }
 0x433   : > { %p1416_p4 = scmp.ne.s32.totalorder %s1876_s18, %s1415_s22  ;;  %p1420_p9 = scmp.lt.u32.totalorder %s1876_s18, %s1925_s7 }
 0x434   : > { %p1421_p10 = scmp.lt.u32.totalorder %s1419_s16, %s1415_s22  ;;  %p1423_p12 = scmp.lt.u32.totalorder %s1415_s22, %s1876_s18 }
 0x435   : > { %p1417_p7 = pnand %p1416_p4, %p1553_p5 }
 0x436   : > { %p1422_p11 = por %p1421_p10, %p1420_p9 }
 0x437   : > { %p1418_p8 = pneg %p1417_p7 }
 0x438   : > { %p1424_p13 = por %p1423_p12, %p1422_p11 }
 0x43a   : > { %p1425_p0 = pnand %p1424_p13, %p1418_p8 }
 0x43c   : > { %1428 = shalt.err (!%p1425_p0)
}
 0x43d   : > { %1317 = dma.vmem_to_hbm [thread:$0]  (%p1553_p5), %s1878_s29, 32, %s1876_s18, %s1109_s28  }
 0x43e PF: > { %p1323_p1 = scmp.ge.s32.totalorder %s1463_s27, 2  ;;  %s1134_s14 = sand.u32 1, %s1451_s24  }
 0x43f   : > { %s1135_s17 = scalar_lea.sflag [#allocation5], %s1134_s14 }
 0x440   : > { %p1320_p2 = pnand %p1323_p1, %p1557_p6 }
 0x442   : > { %1446 = dma.done.wait (!%p1320_p2), %s1135_s17, 32  }
 0x443   : > { %1448 = vsyncadd (!%p1320_p2), %s1135_s17, 4294967264  ;;  %p17_p3 = scmp.ge.s32.totalorder %s1540_s30, 4   ;;  %s1932_s24 = smov %s1455_s25 }
 0x444   : > { %s1933_s25 = smov %s1459_s26  ;;  %s1934_s26 = smov %s1551_s10 }
 0x445   : > { %s1935_s27 = smov %s1540_s30  ;;  %19 = sbr.rel (!%p17_p3) target bundleno = 3 (0x3), region = 83 }
 0x44c   :  { %1140 = vsyncpa [#allocation5], 1 }
 0x44d   :  { %1142 = vsyncpa [#allocation5 + $0x1], 1 }

</bundles_post_ra>
